<compile_context>
chip_gen: v7x
topology: tpu7x:2x2x1
jax: 0.10.0
libtpu: 0.0.40
codegen_flags: <defaults>
</compile_context>

<pallas_src>
import functools

import numpy as np

import jax
import jax.numpy as jnp
from jax.experimental import pallas as pl
from jax.experimental.pallas import tpu as pltpu

NEG = -1e30   # bias for the unused logit lanes (kills them in the softmax)


# ----------------------------------------------------------------------------
# Fused kernel: conv1+pool+relu -> conv2+pool+relu -> fc1+relu -> fc2
#               -> log_softmax.  One batch tile per grid step.
# ----------------------------------------------------------------------------
def _net_kernel(x_ref, w1b_ref, b1p_ref, w2b_ref, b2p_ref,
                fw1p_ref, fb1p_ref, fw2p_ref, fb2p_ref,
                out_ref, acc1_ref, a1_ref, acc2_ref):
    tb = x_ref.shape[1]          # batch tile size (multiple of 8)
    f32 = jnp.float32
    bf16 = jnp.bfloat16

    # --- conv1 (5x5, 1->10): 5 banded MXU matmuls over the kh taps -----------
    # LHS rows = (y, b) come from a leading-dim slice of the [28, tb, 28] image
    # (no sublane-crossing); RHS lanes pack (pool-parity, pooled-x, cout).
    for kh in range(5):
        lhs = x_ref[kh:kh + 24, :, :].reshape(24 * tb, 28).astype(bf16)
        part = jnp.dot(lhs, w1b_ref[kh], preferred_element_type=f32)
        if kh == 0:
            acc1_ref[...] = part
        else:
            acc1_ref[...] += part

    # 2x2 maxpool: y via row pairs, x via the two parity halves of the lane
    # axis; per-channel bias + relu commute with the max, applied afterwards.
    v1 = acc1_ref[...].reshape(12, 2, tb, 256)
    v1 = jnp.maximum(v1[:, 0], v1[:, 1])                   # pool over y
    a1 = jnp.maximum(v1[..., :128], v1[..., 128:])         # pool over x
    a1_ref[...] = jnp.maximum(a1 + b1p_ref[...], 0.0)      # [12, tb, 128]
    # a1 lanes = pooled_x*10 + cin  (120 real lanes) -> dense K for conv2.

    # --- conv2 (5x5, 10->20) + dropout2d(eval) + 2x2 maxpool + relu ----------
    # 5 banded matmuls over kh; K = (x, cin) packed lanes (120/128 real).
    for kh in range(5):
        lhs = a1_ref[kh:kh + 8, :, :].reshape(8 * tb, 128).astype(bf16)
        part = jnp.dot(lhs, w2b_ref[kh], preferred_element_type=f32)
        if kh == 0:
            acc2_ref[...] = part
        else:
            acc2_ref[...] += part

    v2 = acc2_ref[...].reshape(4, 2, tb, 256)
    v2 = jnp.maximum(v2[:, 0], v2[:, 1])                   # pool over y
    a2 = jnp.maximum(v2[..., :128], v2[..., 128:])         # pool over x
    a2 = jnp.maximum(a2 + b2p_ref[...], 0.0)               # [4, tb, 128]

    # --- fc1 (320->50) + relu: ONE matmul, K = 4*128 (320 real lanes) --------
    lhs_fc1 = jnp.concatenate([a2[0], a2[1], a2[2], a2[3]], axis=-1)  # [tb, 512]
    h1 = jnp.dot(lhs_fc1.astype(bf16), fw1p_ref[...],
                 preferred_element_type=f32) + fb1p_ref[...]
    h1 = jnp.maximum(h1, 0.0)                              # [tb, 128]

    # --- fc2 (50->10) + log_softmax (f32 elementwise) ------------------------
    # Padded logit lanes carry a -1e30 bias so they vanish from the softmax.
    y = jnp.dot(h1.astype(bf16), fw2p_ref[...],
                preferred_element_type=f32) + fb2p_ref[...]
    mx = jnp.max(y, axis=-1, keepdims=True)
    lse = mx + jnp.log(jnp.sum(jnp.exp(y - mx), axis=-1, keepdims=True))
    out_ref[0] = y - lse


# ----------------------------------------------------------------------------
# One-time weight repacking: banded conv weights, folded flatten permutation,
# bf16 MXU operands (biases stay f32).
# ----------------------------------------------------------------------------
def prepare_params(params):
    cw1, cb1, cw2, cb2, fw1, fb1, fw2, fb2 = [np.asarray(p, np.float32)
                                              for p in params]

    # conv1 banded RHS: one [28, 256] slab per kh tap.
    #   rows  = x_in (0..27)
    #   lanes = parity*128 + pooled_x*10 + cout   (pooled_x 0..11, cout 0..9)
    w1b = np.zeros((5, 28, 256), np.float32)
    for kh in range(5):
        for kw in range(5):
            for px in range(12):
                for par in range(2):
                    x_in = 2 * px + par + kw
                    base = par * 128 + px * 10
                    w1b[kh, x_in, base:base + 10] = cw1[:, 0, kh, kw]
    b1p = np.zeros((1, 128), np.float32)
    for px in range(12):
        b1p[0, px * 10:px * 10 + 10] = cb1

    # conv2 banded RHS: one [128, 256] slab per kh tap.
    #   rows  = x_in*10 + cin          (x_in 0..11, cin 0..9  -> 120 real)
    #   lanes = parity*128 + pooled_x*20 + cout   (pooled_x 0..3, cout 0..19)
    w2b = np.zeros((5, 128, 256), np.float32)
    for kh in range(5):
        for kw in range(5):
            for px2 in range(4):
                for par in range(2):
                    x_in = 2 * px2 + par + kw
                    base = par * 128 + px2 * 20
                    w2b[kh, x_in * 10:x_in * 10 + 10,
                        base:base + 20] = cw2[:, :, kh, kw].T   # [cin, cout]
    b2p = np.zeros((1, 128), np.float32)
    for px2 in range(4):
        b2p[0, px2 * 20:px2 * 20 + 20] = cb2

    # fc1: K rows = py*128 + px2*20 + cout, folding PyTorch's (c,h,w) flatten.
    fw1p = np.zeros((512, 128), np.float32)
    for py in range(4):
        for px2 in range(4):
            for cout in range(20):
                fw1p[py * 128 + px2 * 20 + cout, :50] = \
                    fw1[:, cout * 16 + py * 4 + px2]
    fb1p = np.zeros((1, 128), np.float32)
    fb1p[0, :50] = fb1

    # fc2
    fw2p = np.zeros((128, 128), np.float32)
    fw2p[:50, :10] = fw2.T
    fb2p = np.full((1, 128), NEG, np.float32)
    fb2p[0, :10] = fb2

    bf = lambda a: jnp.asarray(a, jnp.bfloat16)   # MXU operands
    f = lambda a: jnp.asarray(a, jnp.float32)     # biases stay f32
    return (bf(w1b), f(b1p), bf(w2b), f(b2p), bf(fw1p), f(fb1p), bf(fw2p), f(fb2p))


@functools.partial(jax.jit, static_argnames=("block_b",))
def net_forward(x, prepared, block_b=8):
    w1b, b1p, w2b, b2p, fw1p, fb1p, fw2p, fb2p = prepared
    B = x.shape[0]

    # Batch tile: multiple of 8 (unmasked stores, decent MXU M); pad the batch
    # to a multiple of tb instead of collapsing the grid to a single step.
    tb = max(8, int(block_b))
    tb = ((tb + 7) // 8) * 8
    Bp = ((B + tb - 1) // tb) * tb
    xp = x if Bp == B else jnp.pad(x, ((0, Bp - B), (0, 0), (0, 0), (0, 0)))

    # Only wrapper-side prep: tiny transpose of the RAW image so the conv row
    # axis (y) is a leading dim in VMEM -> kh taps are tile-offset slices.
    x_t = jnp.transpose(xp[:, 0], (1, 0, 2))     # [28, Bp, 28]

    def const_spec(shape):
        n = len(shape)
        return pl.BlockSpec(shape, lambda i, _n=n: (0,) * _n)

    grid_spec = pltpu.PrefetchScalarGridSpec(
        num_scalar_prefetch=0,
        grid=(Bp // tb,),
        in_specs=[
            pl.BlockSpec((28, tb, 28), lambda i: (0, i, 0)),   # raw image block
            const_spec((5, 28, 256)), const_spec((1, 128)),    # conv1 w, b
            const_spec((5, 128, 256)), const_spec((1, 128)),   # conv2 w, b
            const_spec((512, 128)), const_spec((1, 128)),      # fc1  w, b
            const_spec((128, 128)), const_spec((1, 128)),      # fc2  w, b
        ],
        out_specs=pl.BlockSpec((1, tb, 128), lambda i: (i, 0, 0)),
        scratch_shapes=[
            pltpu.VMEM((24 * tb, 256), jnp.float32),   # conv1 accumulator
            pltpu.VMEM((12, tb, 128), jnp.float32),    # conv1 activation
            pltpu.VMEM((8 * tb, 256), jnp.float32),    # conv2 accumulator
        ],
    )
    out = pl.pallas_call(
        _net_kernel,
        out_shape=jax.ShapeDtypeStruct((Bp // tb, tb, 128), jnp.float32),
        grid_spec=grid_spec,
        compiler_params=pltpu.CompilerParams(
            dimension_semantics=("parallel",),
            vmem_limit_bytes=32 * 1024 * 1024),
    )(x_t, w1b, b1p, w2b, b2p, fw1p, fb1p, fw2p, fb2p)
    return out.reshape(Bp, 128)[:B, :10]


# ----------------------------------------------------------------------------
# Deterministic parameter init (PyTorch-style U(-1/sqrt(fan_in), 1/sqrt(fan_in)))
# ----------------------------------------------------------------------------
def init_params(key):
    ks = jax.random.split(key, 8)

    def u(k, shape, fan_in):
        bound = fan_in ** -0.5
        return jax.random.uniform(k, shape, jnp.float32, -bound, bound)

    cw1 = u(ks[0], (10, 1, 5, 5), 25)
    cb1 = u(ks[1], (10,), 25)
    cw2 = u(ks[2], (20, 10, 5, 5), 250)
    cb2 = u(ks[3], (20,), 250)
    fw1 = u(ks[4], (50, 320), 320)
    fb1 = u(ks[5], (50,), 320)
    fw2 = u(ks[6], (10, 50), 50)
    fb2 = u(ks[7], (10,), 50)
    return (cw1, cb1, cw2, cb2, fw1, fb1, fw2, fb2)


# ----------------------------------------------------------------------------
# Pure-JAX f32 reference (mirrors the PyTorch forward in eval mode)
# ----------------------------------------------------------------------------
def reference_forward(x, params):
    cw1, cb1, cw2, cb2, fw1, fb1, fw2, fb2 = params
    hi = jax.lax.Precision.HIGHEST

    def conv(v, w, b):
        y = jax.lax.conv_general_dilated(
            v, w, window_strides=(1, 1), padding='VALID',
            dimension_numbers=('NCHW', 'OIHW', 'NCHW'), precision=hi)
        return y + b[None, :, None, None]

    def maxpool(v):
        return jax.lax.reduce_window(v, -jnp.inf, jax.lax.max,
                                     (1, 1, 2, 2), (1, 1, 2, 2), 'VALID')

    h = jax.nn.relu(maxpool(conv(x, cw1, cb1)))
    h = jax.nn.relu(maxpool(conv(h, cw2, cb2)))
    h = h.reshape(-1, 320)
    h = jax.nn.relu(jnp.dot(h, fw1.T, precision=hi) + fb1)
    h = jnp.dot(h, fw2.T, precision=hi) + fb2
    return jax.nn.log_softmax(h, axis=-1)


if __name__ == "__main__":
    key = jax.random.PRNGKey(0)
    pkey, xkey = jax.random.split(key)
    params = init_params(pkey)
    # fc1 expects 320 = 20*4*4 features -> input spatial size must be 28x28.
    # B=16 with block_b=8 -> 2 grid steps (keeps both v7x TensorCores busy).
    x = jax.random.normal(xkey, (16, 1, 28, 28), jnp.float32)

    prepared = prepare_params(params)                       # hoisted weight packing
    out = jax.block_until_ready(net_forward(x, prepared, block_b=8))
    assert out.shape == (16, 10), out.shape

    ref = jax.block_until_ready(reference_forward(x, params))
    max_err = float(jnp.max(jnp.abs(out - ref)))
    # bf16 MXU operands (f32 accumulation) vs an f32 reference: expected max
    # log-prob error is ~1e-3..1e-2; 2e-2 leaves comfortable margin while still
    # catching any structural/packing bug (which would be O(1)).
    assert jnp.allclose(out, ref, atol=2e-2, rtol=2e-2), (max_err, out, ref)
    assert jnp.allclose(jnp.exp(out).sum(axis=-1), 1.0, atol=1e-4)
    print("KERNEL_OK")
</pallas_src>

<mosaic_0001>
module attributes {stable_mosaic.version = 11 : i64} {
  func.func @_net_kernel(%arg0: i32, %arg1: memref<28x8x28xf32, #tpu.memory_space<vmem>>, %arg2: memref<5x28x256xbf16, #tpu.memory_space<vmem>>, %arg3: memref<1x128xf32, #tpu.memory_space<vmem>>, %arg4: memref<5x128x256xbf16, #tpu.memory_space<vmem>>, %arg5: memref<1x128xf32, #tpu.memory_space<vmem>>, %arg6: memref<512x128xbf16, #tpu.memory_space<vmem>>, %arg7: memref<1x128xf32, #tpu.memory_space<vmem>>, %arg8: memref<128x128xbf16, #tpu.memory_space<vmem>>, %arg9: memref<1x128xf32, #tpu.memory_space<vmem>>, %arg10: memref<1x8x128xf32, #tpu.memory_space<vmem>>, %arg11: memref<192x256xf32, #tpu.memory_space<vmem>>, %arg12: memref<12x8x128xf32, #tpu.memory_space<vmem>>, %arg13: memref<64x256xf32, #tpu.memory_space<vmem>>) attributes {dimension_semantics = [#tpu.dimension_semantics<parallel>], iteration_bounds = array<i64: 2>, scalar_prefetch = 0 : i64, scratch_operands = 3 : i64, tpu.core_type = #tpu.core_type<tc>, window_params = [{transform_indices = @transform_0, window_bounds = array<i64: 28, 8, 28>}, {pipeline_mode = #tpu.pipeline_mode<synchronous>, transform_indices = @transform_1, window_bounds = array<i64: 5, 28, 256>}, {pipeline_mode = #tpu.pipeline_mode<synchronous>, transform_indices = @transform_2, window_bounds = array<i64: 1, 128>}, {pipeline_mode = #tpu.pipeline_mode<synchronous>, transform_indices = @transform_3, window_bounds = array<i64: 5, 128, 256>}, {pipeline_mode = #tpu.pipeline_mode<synchronous>, transform_indices = @transform_4, window_bounds = array<i64: 1, 128>}, {pipeline_mode = #tpu.pipeline_mode<synchronous>, transform_indices = @transform_5, window_bounds = array<i64: 512, 128>}, {pipeline_mode = #tpu.pipeline_mode<synchronous>, transform_indices = @transform_6, window_bounds = array<i64: 1, 128>}, {pipeline_mode = #tpu.pipeline_mode<synchronous>, transform_indices = @transform_7, window_bounds = array<i64: 128, 128>}, {pipeline_mode = #tpu.pipeline_mode<synchronous>, transform_indices = @transform_8, window_bounds = array<i64: 1, 128>}, {transform_indices = @transform_9, window_bounds = array<i64: 1, 8, 128>}]} {
    %c0 = arith.constant 0 : index
    %c0_0 = arith.constant 0 : index
    %c0_1 = arith.constant 0 : index
    %0 = vector.load %arg1[%c0, %c0_0, %c0_1] : memref<28x8x28xf32, #tpu.memory_space<vmem>>, vector<24x8x28xf32>
    %1 = vector.shape_cast %0 : vector<24x8x28xf32> to vector<192x28xf32>
    %2 = arith.truncf %1 : vector<192x28xf32> to vector<192x28xbf16>
    %c0_2 = arith.constant 0 : index
    %c0_3 = arith.constant 0 : index
    %c0_4 = arith.constant 0 : index
    %3 = vector.load %arg2[%c0_2, %c0_3, %c0_4] : memref<5x28x256xbf16, #tpu.memory_space<vmem>>, vector<1x28x256xbf16>
    %4 = vector.shape_cast %3 : vector<1x28x256xbf16> to vector<28x256xbf16>
    %cst = arith.constant dense<0.000000e+00> : vector<192x256xf32>
    %5 = tpu.matmul %2, %4, %cst {dimension_numbers = #tpu.dot_dimension_numbers<[1], [0], [0], [1], [0, 0, 1, 1], [], []>} : vector<192x28xbf16>, vector<28x256xbf16>, vector<192x256xf32> -> vector<192x256xf32>
    %c0_5 = arith.constant 0 : index
    %c0_6 = arith.constant 0 : index
    %6 = vector.load %arg11[%c0_5, %c0_6] : memref<192x256xf32, #tpu.memory_space<vmem>>, vector<192x256xf32>
    tpu.vector_store %arg11[%c0_5, %c0_6], %5 {strides = array<i32>} : memref<192x256xf32, #tpu.memory_space<vmem>>, vector<192x256xf32>,
    %c1 = arith.constant 1 : index
    %c0_7 = arith.constant 0 : index
    %c0_8 = arith.constant 0 : index
    %7 = vector.load %arg1[%c1, %c0_7, %c0_8] : memref<28x8x28xf32, #tpu.memory_space<vmem>>, vector<24x8x28xf32>
    %8 = vector.shape_cast %7 : vector<24x8x28xf32> to vector<192x28xf32>
    %9 = arith.truncf %8 : vector<192x28xf32> to vector<192x28xbf16>
    %c1_9 = arith.constant 1 : index
    %c0_10 = arith.constant 0 : index
    %c0_11 = arith.constant 0 : index
    %10 = vector.load %arg2[%c1_9, %c0_10, %c0_11] : memref<5x28x256xbf16, #tpu.memory_space<vmem>>, vector<1x28x256xbf16>
    %11 = vector.shape_cast %10 : vector<1x28x256xbf16> to vector<28x256xbf16>
    %cst_12 = arith.constant dense<0.000000e+00> : vector<192x256xf32>
    %12 = tpu.matmul %9, %11, %cst_12 {dimension_numbers = #tpu.dot_dimension_numbers<[1], [0], [0], [1], [0, 0, 1, 1], [], []>} : vector<192x28xbf16>, vector<28x256xbf16>, vector<192x256xf32> -> vector<192x256xf32>
    %c0_13 = arith.constant 0 : index
    %c0_14 = arith.constant 0 : index
    %13 = vector.load %arg11[%c0_13, %c0_14] : memref<192x256xf32, #tpu.memory_space<vmem>>, vector<192x256xf32>
    %14 = arith.addf %13, %12 : vector<192x256xf32>
    %c0_15 = arith.constant 0 : index
    %c0_16 = arith.constant 0 : index
    %15 = vector.load %arg11[%c0_15, %c0_16] : memref<192x256xf32, #tpu.memory_space<vmem>>, vector<192x256xf32>
    tpu.vector_store %arg11[%c0_15, %c0_16], %14 {strides = array<i32>} : memref<192x256xf32, #tpu.memory_space<vmem>>, vector<192x256xf32>,
    %c2 = arith.constant 2 : index
    %c0_17 = arith.constant 0 : index
    %c0_18 = arith.constant 0 : index
    %16 = vector.load %arg1[%c2, %c0_17, %c0_18] : memref<28x8x28xf32, #tpu.memory_space<vmem>>, vector<24x8x28xf32>
    %17 = vector.shape_cast %16 : vector<24x8x28xf32> to vector<192x28xf32>
    %18 = arith.truncf %17 : vector<192x28xf32> to vector<192x28xbf16>
    %c2_19 = arith.constant 2 : index
    %c0_20 = arith.constant 0 : index
    %c0_21 = arith.constant 0 : index
    %19 = vector.load %arg2[%c2_19, %c0_20, %c0_21] : memref<5x28x256xbf16, #tpu.memory_space<vmem>>, vector<1x28x256xbf16>
    %20 = vector.shape_cast %19 : vector<1x28x256xbf16> to vector<28x256xbf16>
    %cst_22 = arith.constant dense<0.000000e+00> : vector<192x256xf32>
    %21 = tpu.matmul %18, %20, %cst_22 {dimension_numbers = #tpu.dot_dimension_numbers<[1], [0], [0], [1], [0, 0, 1, 1], [], []>} : vector<192x28xbf16>, vector<28x256xbf16>, vector<192x256xf32> -> vector<192x256xf32>
    %c0_23 = arith.constant 0 : index
    %c0_24 = arith.constant 0 : index
    %22 = vector.load %arg11[%c0_23, %c0_24] : memref<192x256xf32, #tpu.memory_space<vmem>>, vector<192x256xf32>
    %23 = arith.addf %22, %21 : vector<192x256xf32>
    %c0_25 = arith.constant 0 : index
    %c0_26 = arith.constant 0 : index
    %24 = vector.load %arg11[%c0_25, %c0_26] : memref<192x256xf32, #tpu.memory_space<vmem>>, vector<192x256xf32>
    tpu.vector_store %arg11[%c0_25, %c0_26], %23 {strides = array<i32>} : memref<192x256xf32, #tpu.memory_space<vmem>>, vector<192x256xf32>,
    %c3 = arith.constant 3 : index
    %c0_27 = arith.constant 0 : index
    %c0_28 = arith.constant 0 : index
    %25 = vector.load %arg1[%c3, %c0_27, %c0_28] : memref<28x8x28xf32, #tpu.memory_space<vmem>>, vector<24x8x28xf32>
    %26 = vector.shape_cast %25 : vector<24x8x28xf32> to vector<192x28xf32>
    %27 = arith.truncf %26 : vector<192x28xf32> to vector<192x28xbf16>
    %c3_29 = arith.constant 3 : index
    %c0_30 = arith.constant 0 : index
    %c0_31 = arith.constant 0 : index
    %28 = vector.load %arg2[%c3_29, %c0_30, %c0_31] : memref<5x28x256xbf16, #tpu.memory_space<vmem>>, vector<1x28x256xbf16>
    %29 = vector.shape_cast %28 : vector<1x28x256xbf16> to vector<28x256xbf16>
    %cst_32 = arith.constant dense<0.000000e+00> : vector<192x256xf32>
    %30 = tpu.matmul %27, %29, %cst_32 {dimension_numbers = #tpu.dot_dimension_numbers<[1], [0], [0], [1], [0, 0, 1, 1], [], []>} : vector<192x28xbf16>, vector<28x256xbf16>, vector<192x256xf32> -> vector<192x256xf32>
    %c0_33 = arith.constant 0 : index
    %c0_34 = arith.constant 0 : index
    %31 = vector.load %arg11[%c0_33, %c0_34] : memref<192x256xf32, #tpu.memory_space<vmem>>, vector<192x256xf32>
    %32 = arith.addf %31, %30 : vector<192x256xf32>
    %c0_35 = arith.constant 0 : index
    %c0_36 = arith.constant 0 : index
    %33 = vector.load %arg11[%c0_35, %c0_36] : memref<192x256xf32, #tpu.memory_space<vmem>>, vector<192x256xf32>
    tpu.vector_store %arg11[%c0_35, %c0_36], %32 {strides = array<i32>} : memref<192x256xf32, #tpu.memory_space<vmem>>, vector<192x256xf32>,
    %c4 = arith.constant 4 : index
    %c0_37 = arith.constant 0 : index
    %c0_38 = arith.constant 0 : index
    %34 = vector.load %arg1[%c4, %c0_37, %c0_38] : memref<28x8x28xf32, #tpu.memory_space<vmem>>, vector<24x8x28xf32>
    %35 = vector.shape_cast %34 : vector<24x8x28xf32> to vector<192x28xf32>
    %36 = arith.truncf %35 : vector<192x28xf32> to vector<192x28xbf16>
    %c4_39 = arith.constant 4 : index
    %c0_40 = arith.constant 0 : index
    %c0_41 = arith.constant 0 : index
    %37 = vector.load %arg2[%c4_39, %c0_40, %c0_41] : memref<5x28x256xbf16, #tpu.memory_space<vmem>>, vector<1x28x256xbf16>
    %38 = vector.shape_cast %37 : vector<1x28x256xbf16> to vector<28x256xbf16>
    %cst_42 = arith.constant dense<0.000000e+00> : vector<192x256xf32>
    %39 = tpu.matmul %36, %38, %cst_42 {dimension_numbers = #tpu.dot_dimension_numbers<[1], [0], [0], [1], [0, 0, 1, 1], [], []>} : vector<192x28xbf16>, vector<28x256xbf16>, vector<192x256xf32> -> vector<192x256xf32>
    %c0_43 = arith.constant 0 : index
    %c0_44 = arith.constant 0 : index
    %40 = vector.load %arg11[%c0_43, %c0_44] : memref<192x256xf32, #tpu.memory_space<vmem>>, vector<192x256xf32>
    %41 = arith.addf %40, %39 : vector<192x256xf32>
    %c0_45 = arith.constant 0 : index
    %c0_46 = arith.constant 0 : index
    %42 = vector.load %arg11[%c0_45, %c0_46] : memref<192x256xf32, #tpu.memory_space<vmem>>, vector<192x256xf32>
    tpu.vector_store %arg11[%c0_45, %c0_46], %41 {strides = array<i32>} : memref<192x256xf32, #tpu.memory_space<vmem>>, vector<192x256xf32>,
    %c0_47 = arith.constant 0 : index
    %c0_48 = arith.constant 0 : index
    %43 = vector.load %arg11[%c0_47, %c0_48] : memref<192x256xf32, #tpu.memory_space<vmem>>, vector<192x256xf32>
    %44 = vector.shape_cast %43 : vector<192x256xf32> to vector<12x2x8x256xf32>
    %45 = vector.extract_strided_slice %44 {offsets = [0, 0, 0, 0], sizes = [12, 1, 8, 256], strides = [1, 1, 1, 1]} : vector<12x2x8x256xf32> to vector<12x1x8x256xf32>
    %46 = vector.shape_cast %45 : vector<12x1x8x256xf32> to vector<12x8x256xf32>
    %47 = vector.extract_strided_slice %44 {offsets = [0, 1, 0, 0], sizes = [12, 1, 8, 256], strides = [1, 1, 1, 1]} : vector<12x2x8x256xf32> to vector<12x1x8x256xf32>
    %48 = vector.shape_cast %47 : vector<12x1x8x256xf32> to vector<12x8x256xf32>
    %49 = arith.maximumf %46, %48 : vector<12x8x256xf32>
    %50 = vector.extract_strided_slice %49 {offsets = [0, 0, 0], sizes = [12, 8, 128], strides = [1, 1, 1]} : vector<12x8x256xf32> to vector<12x8x128xf32>
    %51 = vector.extract_strided_slice %49 {offsets = [0, 0, 128], sizes = [12, 8, 128], strides = [1, 1, 1]} : vector<12x8x256xf32> to vector<12x8x128xf32>
    %52 = arith.maximumf %50, %51 : vector<12x8x128xf32>
    %c0_49 = arith.constant 0 : index
    %c0_50 = arith.constant 0 : index
    %53 = vector.load %arg3[%c0_49, %c0_50] : memref<1x128xf32, #tpu.memory_space<vmem>>, vector<1x128xf32>
    %54 = vector.shape_cast %53 : vector<1x128xf32> to vector<1x1x128xf32>
    %55 = vector.broadcast %54 : vector<1x1x128xf32> to vector<12x8x128xf32>
    %56 = arith.addf %52, %55 : vector<12x8x128xf32>
    %cst_51 = arith.constant 0.000000e+00 : f32
    %57 = vector.broadcast %cst_51 : f32 to vector<12x8x128xf32>
    %58 = arith.maximumf %56, %57 : vector<12x8x128xf32>
    %c0_52 = arith.constant 0 : index
    %c0_53 = arith.constant 0 : index
    %c0_54 = arith.constant 0 : index
    %59 = vector.load %arg12[%c0_52, %c0_53, %c0_54] : memref<12x8x128xf32, #tpu.memory_space<vmem>>, vector<12x8x128xf32>
    tpu.vector_store %arg12[%c0_52, %c0_53, %c0_54], %58 {strides = array<i32>} : memref<12x8x128xf32, #tpu.memory_space<vmem>>, vector<12x8x128xf32>,
    %c0_55 = arith.constant 0 : index
    %c0_56 = arith.constant 0 : index
    %c0_57 = arith.constant 0 : index
    %60 = vector.load %arg12[%c0_55, %c0_56, %c0_57] : memref<12x8x128xf32, #tpu.memory_space<vmem>>, vector<8x8x128xf32>
    %61 = vector.shape_cast %60 : vector<8x8x128xf32> to vector<64x128xf32>
    %62 = arith.truncf %61 : vector<64x128xf32> to vector<64x128xbf16>
    %c0_58 = arith.constant 0 : index
    %c0_59 = arith.constant 0 : index
    %c0_60 = arith.constant 0 : index
    %63 = vector.load %arg4[%c0_58, %c0_59, %c0_60] : memref<5x128x256xbf16, #tpu.memory_space<vmem>>, vector<1x128x256xbf16>
    %64 = vector.shape_cast %63 : vector<1x128x256xbf16> to vector<128x256xbf16>
    %cst_61 = arith.constant dense<0.000000e+00> : vector<64x256xf32>
    %65 = tpu.matmul %62, %64, %cst_61 {dimension_numbers = #tpu.dot_dimension_numbers<[1], [0], [0], [1], [0, 0, 1, 1], [], []>} : vector<64x128xbf16>, vector<128x256xbf16>, vector<64x256xf32> -> vector<64x256xf32>
    %c0_62 = arith.constant 0 : index
    %c0_63 = arith.constant 0 : index
    %66 = vector.load %arg13[%c0_62, %c0_63] : memref<64x256xf32, #tpu.memory_space<vmem>>, vector<64x256xf32>
    tpu.vector_store %arg13[%c0_62, %c0_63], %65 {strides = array<i32>} : memref<64x256xf32, #tpu.memory_space<vmem>>, vector<64x256xf32>,
    %c1_64 = arith.constant 1 : index
    %c0_65 = arith.constant 0 : index
    %c0_66 = arith.constant 0 : index
    %67 = vector.load %arg12[%c1_64, %c0_65, %c0_66] : memref<12x8x128xf32, #tpu.memory_space<vmem>>, vector<8x8x128xf32>
    %68 = vector.shape_cast %67 : vector<8x8x128xf32> to vector<64x128xf32>
    %69 = arith.truncf %68 : vector<64x128xf32> to vector<64x128xbf16>
    %c1_67 = arith.constant 1 : index
    %c0_68 = arith.constant 0 : index
    %c0_69 = arith.constant 0 : index
    %70 = vector.load %arg4[%c1_67, %c0_68, %c0_69] : memref<5x128x256xbf16, #tpu.memory_space<vmem>>, vector<1x128x256xbf16>
    %71 = vector.shape_cast %70 : vector<1x128x256xbf16> to vector<128x256xbf16>
    %cst_70 = arith.constant dense<0.000000e+00> : vector<64x256xf32>
    %72 = tpu.matmul %69, %71, %cst_70 {dimension_numbers = #tpu.dot_dimension_numbers<[1], [0], [0], [1], [0, 0, 1, 1], [], []>} : vector<64x128xbf16>, vector<128x256xbf16>, vector<64x256xf32> -> vector<64x256xf32>
    %c0_71 = arith.constant 0 : index
    %c0_72 = arith.constant 0 : index
    %73 = vector.load %arg13[%c0_71, %c0_72] : memref<64x256xf32, #tpu.memory_space<vmem>>, vector<64x256xf32>
    %74 = arith.addf %73, %72 : vector<64x256xf32>
    %c0_73 = arith.constant 0 : index
    %c0_74 = arith.constant 0 : index
    %75 = vector.load %arg13[%c0_73, %c0_74] : memref<64x256xf32, #tpu.memory_space<vmem>>, vector<64x256xf32>
    tpu.vector_store %arg13[%c0_73, %c0_74], %74 {strides = array<i32>} : memref<64x256xf32, #tpu.memory_space<vmem>>, vector<64x256xf32>,
    %c2_75 = arith.constant 2 : index
    %c0_76 = arith.constant 0 : index
    %c0_77 = arith.constant 0 : index
    %76 = vector.load %arg12[%c2_75, %c0_76, %c0_77] : memref<12x8x128xf32, #tpu.memory_space<vmem>>, vector<8x8x128xf32>
    %77 = vector.shape_cast %76 : vector<8x8x128xf32> to vector<64x128xf32>
    %78 = arith.truncf %77 : vector<64x128xf32> to vector<64x128xbf16>
    %c2_78 = arith.constant 2 : index
    %c0_79 = arith.constant 0 : index
    %c0_80 = arith.constant 0 : index
    %79 = vector.load %arg4[%c2_78, %c0_79, %c0_80] : memref<5x128x256xbf16, #tpu.memory_space<vmem>>, vector<1x128x256xbf16>
    %80 = vector.shape_cast %79 : vector<1x128x256xbf16> to vector<128x256xbf16>
    %cst_81 = arith.constant dense<0.000000e+00> : vector<64x256xf32>
    %81 = tpu.matmul %78, %80, %cst_81 {dimension_numbers = #tpu.dot_dimension_numbers<[1], [0], [0], [1], [0, 0, 1, 1], [], []>} : vector<64x128xbf16>, vector<128x256xbf16>, vector<64x256xf32> -> vector<64x256xf32>
    %c0_82 = arith.constant 0 : index
    %c0_83 = arith.constant 0 : index
    %82 = vector.load %arg13[%c0_82, %c0_83] : memref<64x256xf32, #tpu.memory_space<vmem>>, vector<64x256xf32>
    %83 = arith.addf %82, %81 : vector<64x256xf32>
    %c0_84 = arith.constant 0 : index
    %c0_85 = arith.constant 0 : index
    %84 = vector.load %arg13[%c0_84, %c0_85] : memref<64x256xf32, #tpu.memory_space<vmem>>, vector<64x256xf32>
    tpu.vector_store %arg13[%c0_84, %c0_85], %83 {strides = array<i32>} : memref<64x256xf32, #tpu.memory_space<vmem>>, vector<64x256xf32>,
    %c3_86 = arith.constant 3 : index
    %c0_87 = arith.constant 0 : index
    %c0_88 = arith.constant 0 : index
    %85 = vector.load %arg12[%c3_86, %c0_87, %c0_88] : memref<12x8x128xf32, #tpu.memory_space<vmem>>, vector<8x8x128xf32>
    %86 = vector.shape_cast %85 : vector<8x8x128xf32> to vector<64x128xf32>
    %87 = arith.truncf %86 : vector<64x128xf32> to vector<64x128xbf16>
    %c3_89 = arith.constant 3 : index
    %c0_90 = arith.constant 0 : index
    %c0_91 = arith.constant 0 : index
    %88 = vector.load %arg4[%c3_89, %c0_90, %c0_91] : memref<5x128x256xbf16, #tpu.memory_space<vmem>>, vector<1x128x256xbf16>
    %89 = vector.shape_cast %88 : vector<1x128x256xbf16> to vector<128x256xbf16>
    %cst_92 = arith.constant dense<0.000000e+00> : vector<64x256xf32>
    %90 = tpu.matmul %87, %89, %cst_92 {dimension_numbers = #tpu.dot_dimension_numbers<[1], [0], [0], [1], [0, 0, 1, 1], [], []>} : vector<64x128xbf16>, vector<128x256xbf16>, vector<64x256xf32> -> vector<64x256xf32>
    %c0_93 = arith.constant 0 : index
    %c0_94 = arith.constant 0 : index
    %91 = vector.load %arg13[%c0_93, %c0_94] : memref<64x256xf32, #tpu.memory_space<vmem>>, vector<64x256xf32>
    %92 = arith.addf %91, %90 : vector<64x256xf32>
    %c0_95 = arith.constant 0 : index
    %c0_96 = arith.constant 0 : index
    %93 = vector.load %arg13[%c0_95, %c0_96] : memref<64x256xf32, #tpu.memory_space<vmem>>, vector<64x256xf32>
    tpu.vector_store %arg13[%c0_95, %c0_96], %92 {strides = array<i32>} : memref<64x256xf32, #tpu.memory_space<vmem>>, vector<64x256xf32>,
    %c4_97 = arith.constant 4 : index
    %c0_98 = arith.constant 0 : index
    %c0_99 = arith.constant 0 : index
    %94 = vector.load %arg12[%c4_97, %c0_98, %c0_99] : memref<12x8x128xf32, #tpu.memory_space<vmem>>, vector<8x8x128xf32>
    %95 = vector.shape_cast %94 : vector<8x8x128xf32> to vector<64x128xf32>
    %96 = arith.truncf %95 : vector<64x128xf32> to vector<64x128xbf16>
    %c4_100 = arith.constant 4 : index
    %c0_101 = arith.constant 0 : index
    %c0_102 = arith.constant 0 : index
    %97 = vector.load %arg4[%c4_100, %c0_101, %c0_102] : memref<5x128x256xbf16, #tpu.memory_space<vmem>>, vector<1x128x256xbf16>
    %98 = vector.shape_cast %97 : vector<1x128x256xbf16> to vector<128x256xbf16>
    %cst_103 = arith.constant dense<0.000000e+00> : vector<64x256xf32>
    %99 = tpu.matmul %96, %98, %cst_103 {dimension_numbers = #tpu.dot_dimension_numbers<[1], [0], [0], [1], [0, 0, 1, 1], [], []>} : vector<64x128xbf16>, vector<128x256xbf16>, vector<64x256xf32> -> vector<64x256xf32>
    %c0_104 = arith.constant 0 : index
    %c0_105 = arith.constant 0 : index
    %100 = vector.load %arg13[%c0_104, %c0_105] : memref<64x256xf32, #tpu.memory_space<vmem>>, vector<64x256xf32>
    %101 = arith.addf %100, %99 : vector<64x256xf32>
    %c0_106 = arith.constant 0 : index
    %c0_107 = arith.constant 0 : index
    %102 = vector.load %arg13[%c0_106, %c0_107] : memref<64x256xf32, #tpu.memory_space<vmem>>, vector<64x256xf32>
    tpu.vector_store %arg13[%c0_106, %c0_107], %101 {strides = array<i32>} : memref<64x256xf32, #tpu.memory_space<vmem>>, vector<64x256xf32>,
    %c0_108 = arith.constant 0 : index
    %c0_109 = arith.constant 0 : index
    %103 = vector.load %arg13[%c0_108, %c0_109] : memref<64x256xf32, #tpu.memory_space<vmem>>, vector<64x256xf32>
    %104 = vector.shape_cast %103 : vector<64x256xf32> to vector<4x2x8x256xf32>
    %105 = vector.extract_strided_slice %104 {offsets = [0, 0, 0, 0], sizes = [4, 1, 8, 256], strides = [1, 1, 1, 1]} : vector<4x2x8x256xf32> to vector<4x1x8x256xf32>
    %106 = vector.shape_cast %105 : vector<4x1x8x256xf32> to vector<4x8x256xf32>
    %107 = vector.extract_strided_slice %104 {offsets = [0, 1, 0, 0], sizes = [4, 1, 8, 256], strides = [1, 1, 1, 1]} : vector<4x2x8x256xf32> to vector<4x1x8x256xf32>
    %108 = vector.shape_cast %107 : vector<4x1x8x256xf32> to vector<4x8x256xf32>
    %109 = arith.maximumf %106, %108 : vector<4x8x256xf32>
    %110 = vector.extract_strided_slice %109 {offsets = [0, 0, 0], sizes = [4, 8, 128], strides = [1, 1, 1]} : vector<4x8x256xf32> to vector<4x8x128xf32>
    %111 = vector.extract_strided_slice %109 {offsets = [0, 0, 128], sizes = [4, 8, 128], strides = [1, 1, 1]} : vector<4x8x256xf32> to vector<4x8x128xf32>
    %112 = arith.maximumf %110, %111 : vector<4x8x128xf32>
    %c0_110 = arith.constant 0 : index
    %c0_111 = arith.constant 0 : index
    %113 = vector.load %arg5[%c0_110, %c0_111] : memref<1x128xf32, #tpu.memory_space<vmem>>, vector<1x128xf32>
    %114 = vector.shape_cast %113 : vector<1x128xf32> to vector<1x1x128xf32>
    %115 = vector.broadcast %114 : vector<1x1x128xf32> to vector<4x8x128xf32>
    %116 = arith.addf %112, %115 : vector<4x8x128xf32>
    %cst_112 = arith.constant 0.000000e+00 : f32
    %117 = vector.broadcast %cst_112 : f32 to vector<4x8x128xf32>
    %118 = arith.maximumf %116, %117 : vector<4x8x128xf32>
    %119 = vector.extract_strided_slice %118 {offsets = [0, 0, 0], sizes = [1, 8, 128], strides = [1, 1, 1]} : vector<4x8x128xf32> to vector<1x8x128xf32>
    %120 = vector.shape_cast %119 : vector<1x8x128xf32> to vector<8x128xf32>
    %121 = vector.extract_strided_slice %118 {offsets = [1, 0, 0], sizes = [1, 8, 128], strides = [1, 1, 1]} : vector<4x8x128xf32> to vector<1x8x128xf32>
    %122 = vector.shape_cast %121 : vector<1x8x128xf32> to vector<8x128xf32>
    %123 = vector.extract_strided_slice %118 {offsets = [2, 0, 0], sizes = [1, 8, 128], strides = [1, 1, 1]} : vector<4x8x128xf32> to vector<1x8x128xf32>
    %124 = vector.shape_cast %123 : vector<1x8x128xf32> to vector<8x128xf32>
    %125 = vector.extract_strided_slice %118 {offsets = [3, 0, 0], sizes = [1, 8, 128], strides = [1, 1, 1]} : vector<4x8x128xf32> to vector<1x8x128xf32>
    %126 = vector.shape_cast %125 : vector<1x8x128xf32> to vector<8x128xf32>
    %127 = tpu.concatenate %120, %122, %124, %126 in 1 : vector<8x128xf32>, vector<8x128xf32>, vector<8x128xf32>, vector<8x128xf32> -> vector<8x512xf32>
    %128 = arith.truncf %127 : vector<8x512xf32> to vector<8x512xbf16>
    %c0_113 = arith.constant 0 : index
    %c0_114 = arith.constant 0 : index
    %129 = vector.load %arg6[%c0_113, %c0_114] : memref<512x128xbf16, #tpu.memory_space<vmem>>, vector<512x128xbf16>
    %cst_115 = arith.constant dense<0.000000e+00> : vector<8x128xf32>
    %130 = tpu.matmul %128, %129, %cst_115 {dimension_numbers = #tpu.dot_dimension_numbers<[1], [0], [0], [1], [0, 0, 1, 1], [], []>} : vector<8x512xbf16>, vector<512x128xbf16>, vector<8x128xf32> -> vector<8x128xf32>
    %c0_116 = arith.constant 0 : index
    %c0_117 = arith.constant 0 : index
    %131 = vector.load %arg7[%c0_116, %c0_117] : memref<1x128xf32, #tpu.memory_space<vmem>>, vector<1x128xf32>
    %132 = vector.broadcast %131 : vector<1x128xf32> to vector<8x128xf32>
    %133 = arith.addf %130, %132 : vector<8x128xf32>
    %cst_118 = arith.constant 0.000000e+00 : f32
    %134 = vector.broadcast %cst_118 : f32 to vector<8x128xf32>
    %135 = arith.maximumf %133, %134 : vector<8x128xf32>
    %136 = arith.truncf %135 : vector<8x128xf32> to vector<8x128xbf16>
    %c0_119 = arith.constant 0 : index
    %c0_120 = arith.constant 0 : index
    %137 = vector.load %arg8[%c0_119, %c0_120] : memref<128x128xbf16, #tpu.memory_space<vmem>>, vector<128x128xbf16>
    %cst_121 = arith.constant dense<0.000000e+00> : vector<8x128xf32>
    %138 = tpu.matmul %136, %137, %cst_121 {dimension_numbers = #tpu.dot_dimension_numbers<[1], [0], [0], [1], [0, 0, 1, 1], [], []>} : vector<8x128xbf16>, vector<128x128xbf16>, vector<8x128xf32> -> vector<8x128xf32>
    %c0_122 = arith.constant 0 : index
    %c0_123 = arith.constant 0 : index
    %139 = vector.load %arg9[%c0_122, %c0_123] : memref<1x128xf32, #tpu.memory_space<vmem>>, vector<1x128xf32>
    %140 = vector.broadcast %139 : vector<1x128xf32> to vector<8x128xf32>
    %141 = arith.addf %138, %140 : vector<8x128xf32>
    %cst_124 = arith.constant dense<0xFF800000> : vector<8xf32>
    %142 = vector.multi_reduction <maximumf>, %141, %cst_124 [1] : vector<8x128xf32> to vector<8xf32>
    %143 = vector.shape_cast %142 : vector<8xf32> to vector<8x1xf32>
    %144 = vector.broadcast %143 : vector<8x1xf32> to vector<8x128xf32>
    %145 = arith.subf %141, %144 : vector<8x128xf32>
    %146 = math.exp %145 : vector<8x128xf32>
    %cst_125 = arith.constant dense<0.000000e+00> : vector<8xf32>
    %147 = vector.multi_reduction <add>, %146, %cst_125 [1] : vector<8x128xf32> to vector<8xf32>
    %148 = vector.shape_cast %147 : vector<8xf32> to vector<8x1xf32>
    %149 = math.log %148 : vector<8x1xf32>
    %150 = arith.addf %143, %149 : vector<8x1xf32>
    %151 = vector.broadcast %150 : vector<8x1xf32> to vector<8x128xf32>
    %152 = arith.subf %141, %151 : vector<8x128xf32>
    %c0_126 = arith.constant 0 : index
    %c0_127 = arith.constant 0 : index
    %c0_128 = arith.constant 0 : index
    %153 = vector.load %arg10[%c0_126, %c0_127, %c0_128] : memref<1x8x128xf32, #tpu.memory_space<vmem>>, vector<1x8x128xf32>
    %154 = vector.shape_cast %153 : vector<1x8x128xf32> to vector<8x128xf32>
    %155 = vector.shape_cast %152 : vector<8x128xf32> to vector<1x8x128xf32>
    tpu.vector_store %arg10[%c0_126, %c0_127, %c0_128], %155 {strides = array<i32>} : memref<1x8x128xf32, #tpu.memory_space<vmem>>, vector<1x8x128xf32>,
    return
  }
  func.func @transform_0(%arg0: i32) -> (i32, i32, i32) {
    %c0_i32 = arith.constant 0 : i32
    %c0_i32_0 = arith.constant 0 : i32
    %c0_i32_1 = arith.constant 0 : i32
    return %c0_i32, %arg0, %c0_i32_0 : i32, i32, i32
  }
  func.func @transform_1(%arg0: i32) -> (i32, i32, i32) {
    %c0_i32 = arith.constant 0 : i32
    %c0_i32_0 = arith.constant 0 : i32
    %c0_i32_1 = arith.constant 0 : i32
    %c0_i32_2 = arith.constant 0 : i32
    return %c0_i32, %c0_i32_0, %c0_i32_1 : i32, i32, i32
  }
  func.func @transform_2(%arg0: i32) -> (i32, i32) {
    %c0_i32 = arith.constant 0 : i32
    %c0_i32_0 = arith.constant 0 : i32
    %c0_i32_1 = arith.constant 0 : i32
    return %c0_i32, %c0_i32_0 : i32, i32
  }
  func.func @transform_3(%arg0: i32) -> (i32, i32, i32) {
    %c0_i32 = arith.constant 0 : i32
    %c0_i32_0 = arith.constant 0 : i32
    %c0_i32_1 = arith.constant 0 : i32
    %c0_i32_2 = arith.constant 0 : i32
    return %c0_i32, %c0_i32_0, %c0_i32_1 : i32, i32, i32
  }
  func.func @transform_4(%arg0: i32) -> (i32, i32) {
    %c0_i32 = arith.constant 0 : i32
    %c0_i32_0 = arith.constant 0 : i32
    %c0_i32_1 = arith.constant 0 : i32
    return %c0_i32, %c0_i32_0 : i32, i32
  }
  func.func @transform_5(%arg0: i32) -> (i32, i32) {
    %c0_i32 = arith.constant 0 : i32
    %c0_i32_0 = arith.constant 0 : i32
    %c0_i32_1 = arith.constant 0 : i32
    return %c0_i32, %c0_i32_0 : i32, i32
  }
  func.func @transform_6(%arg0: i32) -> (i32, i32) {
    %c0_i32 = arith.constant 0 : i32
    %c0_i32_0 = arith.constant 0 : i32
    %c0_i32_1 = arith.constant 0 : i32
    return %c0_i32, %c0_i32_0 : i32, i32
  }
  func.func @transform_7(%arg0: i32) -> (i32, i32) {
    %c0_i32 = arith.constant 0 : i32
    %c0_i32_0 = arith.constant 0 : i32
    %c0_i32_1 = arith.constant 0 : i32
    return %c0_i32, %c0_i32_0 : i32, i32
  }
  func.func @transform_8(%arg0: i32) -> (i32, i32) {
    %c0_i32 = arith.constant 0 : i32
    %c0_i32_0 = arith.constant 0 : i32
    %c0_i32_1 = arith.constant 0 : i32
    return %c0_i32, %c0_i32_0 : i32, i32
  }
  func.func @transform_9(%arg0: i32) -> (i32, i32, i32) {
    %c0_i32 = arith.constant 0 : i32
    %c0_i32_0 = arith.constant 0 : i32
    %c0_i32_1 = arith.constant 0 : i32
    return %arg0, %c0_i32, %c0_i32_0 : i32, i32, i32
  }
}

</mosaic_0001>

<bundles_post_ra>
// kernel: net_forward.1
= control target key start
LH: loop header
LB: loop body
LE: loop exit
PB: predicated region body
PF: predicated region fallthrough
CT: control target
= control target key end

     0   :  { %14 = vsyncpa [#allocation7], 0  ;;  %s6513_s0 = inlined_call_operand.vmem [shape: f32[28,16,28], index: 0, kind: input, shape index: {}]   ;;  %s6514_s1 = inlined_call_operand.hbm [shape: bf16[5,28,256], index: 1, kind: input, shape index: {}]   ;;  %s6515_s2 = inlined_call_operand.vmem [shape: f32[1,128], index: 2, kind: input, shape index: {}]   ;;  %s6516_s3 = inlined_call_operand.vmem [shape: bf16[5,128,256], index: 3, kind: input, shape index: {}]   ;;  %s6517_s4 = inlined_call_operand.vmem [shape: f32[1,128], index: 4, kind: input, shape index: {}]   ;;  %s6518_s5 = inlined_call_operand.vmem [shape: bf16[512,128], index: 5, kind: input, shape index: {}]   ;;  %s6519_s6 = inlined_call_operand.vmem [shape: f32[1,128], index: 6, kind: input, shape index: {}]   ;;  %s6520_s7 = inlined_call_operand.hbm [shape: bf16[128,128], index: 7, kind: input, shape index: {}]   ;;  %s6521_s8 = inlined_call_operand.vmem [shape: f32[1,128], index: 8, kind: input, shape index: {}]   ;;  %s6522_s9 = inlined_call_operand.hbm [shape: f32[2,8,128], index: 9, kind: output, shape index: {}]  }
   0x1   :  { %15 = vsyncpa [#allocation10], 0 }
   0x2   :  { %16 = vsyncpa [#allocation8], 0 }
   0x3   :  { %18 = vsyncpa [#allocation8 + $0x1], 0  ;;  %s5430_s30 = smov 0   ;;  %s5432_s10 = smov 0  }
   0x4   :  { %s5434_s11 = smov 0   ;;  %s5436_s12 = smov 0  }
   0x5 LB: > { %6532 = sst [smem:[#allocation15_spill]] %s5356_s30  ;;  %s5451_s13 = sadd.s32 4294967295, %s5368_s12   ;;  %s5368_s12 = sphi %s5436_s12, %s6552_s12   ;;  %s5364_s11 = sphi %s5434_s11, %s6556_s11   ;;  %s5360_s10 = sphi %s5432_s10, %s6555_s10   ;;  %s5356_s30 = sphi %s5430_s30, %s6554_s30  }
   0x6   : > { %s4267_s14 = sadd.s32 4294967294, %s5368_s12   ;;  %s5455_s15 = sadd.s32 1, %s5368_s12  }
   0x7   : > { %6533 = sst [smem:[#allocation16_spill]] %s5455_s15  ;;  %s31_s16 = sadd.s32 1, %s5364_s11 }
   0x8   : > { %s28_s17 = ssub.s32 %s5368_s12, %s5455_s15  ;;  %p38_p0 = scmp.ne.s32.totalorder %s5364_s11, %s5360_s10 }
   0x9   : > { %p29_p1 = scmp.eq.s32.totalorder %s28_s17, 0  ;;  %p39_p2 = scmp.eq.s32.totalorder %s5368_s12, 0 }
   0xa   : > { %p236_p3 = scmp.eq.s32.totalorder %s5451_s13, 1  ;;  %p241_p4 = scmp.ne.s32.totalorder %s5360_s10, %s5356_s30 }
   0xb   : > { %s5467_s18 = scalar_select %p29_p1, %s5364_s11, %s31_s16  }
   0xc   : > { %p5469_p5 = por %p39_p2, %p38_p0  ;;  %p5473_p6 = por %p236_p3, %p38_p0 }
   0xd   : > { %6534 = sst [smem:[#allocation17_spill]] %s5467_s18  ;;  %p242_p7 = scmp.eq.s32.totalorder %s4267_s14, 1 }
   0xe   : > { %s6535_s19 = scalar_select %p5469_p5, 1, 0 }
   0xf   : > { %s6536_s20 = scalar_select %p5473_p6, 1, 0 }
  0x10   : > { %p4268_p8 = scmp.ge.s32.totalorder %s5368_s12, 1  ;;  %p249_p9 = scmp.lt.s32.totalorder %s5368_s12, 3 }
  0x11   : > { %p5479_p10 = por %p242_p7, %p241_p4  ;;  %p6523_p11 = scmp.eq.s32.totalorder %s5451_s13, 0 }
  0x12   : > { %p5484_p12 = pnand %p4268_p8, %p249_p9  ;;  %s5370_s23 = smov [#allocation6]  }
  0x13   : > { %s6537_s21 = scalar_select %p5479_p10, 1, 0 }
  0x14   : > { %s6539_s22 = scalar_select %p5484_p12, 1, 0 }
  0x15   : > { %6538 = sst [smem:[#allocation18_spill]] %s6537_s21  ;;  %s261_s24 = sshll.u32 %s5370_s23, 4  ;;  %s262_s24 = int_to_ptr.vmem [resolvable:$true] %s261_s24 }
  0x16   : > { %p4991_p13 = pneg %p5484_p12  ;;  %s5371_s26 = smov [#allocation9]  }
  0x17   : > { %s289_s27 = sshll.u32 %s5371_s26, 4  ;;  %s5242_s14 = scalar_lea.hbm %s6514_s1, 2560  ;;  %s5496_s27 = int_to_ptr.vmem [resolvable:$true] %s289_s27 }
  0x18   : > { %p5492_p0 = pnand %p6523_p11, %p4991_p13  ;;  %p5243_p1 = scmp.ne.s32.totalorder %s6514_s1, %s5242_s14 }
  0x19   : > { %p5249_p7 = scmp.lt.u32.totalorder %s5242_s14, %s6514_s1 }
  0x1a   : > { %p5244_p2 = pneg %p5492_p0 }
  0x1c   : > { %p5245_p3 = pnand %p5244_p2, %p5243_p1 }
  0x1e   : > { %p5246_p4 = pneg %p5245_p3 }
  0x20   : > { %p5251_p8 = pnand %p5249_p7, %p5246_p4 }
  0x22   : > { %5254 = shalt.err (!%p5251_p8)
}
  0x23   : > { %s5255_s26 = scalar_lea.vmem %s262_s24, 2560  ;;  %p5263_p10 = scmp.lt.s32.totalorder %s262_s24, %s262_s24 }
  0x24   : > { %p5256_p9 = scmp.ne.s32.totalorder %s262_s24, %s5255_s26  ;;  %p5264_p6 = scmp.lt.s32.totalorder %s5255_s26, %s5255_s26 }
  0x26   : > { %p5258_p13 = pnand %p5256_p9, %p5244_p2  ;;  %p5265_p12 = por %p5264_p6, %p5263_p10 }
  0x28   : > { %p5259_p11 = pneg %p5258_p13 }
  0x2a   : > { %p5266_p5 = pnand %p5265_p12, %p5259_p11 }
  0x2c   : > { %5269 = shalt.err (!%p5266_p5)
}
  0x2d   : > { %s5372_s28 = smov 128   ;;  %s5373_s29 = smov 8  }
  0x2e   : > { %4994 = dma.hbm_to_vmem [thread:$0]  (!%p5492_p0), %s6514_s1, 2560, %s262_s24, [#allocation7], %s5372_s28, %s5372_s28, %s5373_s29  }
  0x2f   : > { %s5270_s23 = scalar_lea.hbm %s6520_s7, 1024 }
  0x30   : > { %p5271_p1 = scmp.ne.s32.totalorder %s6520_s7, %s5270_s23  ;;  %p5277_p10 = scmp.lt.u32.totalorder %s5270_s23, %s6520_s7 }
  0x32   : > { %p5273_p5 = pnand %p5271_p1, %p5244_p2 }
  0x34   : > { %p5274_p6 = pneg %p5273_p5 }
  0x36   : > { %p5279_p11 = pnand %p5277_p10, %p5274_p6 }
  0x38   : > { %5282 = shalt.err (!%p5279_p11)
}
  0x39   : > { %s5283_s24 = scalar_lea.vmem %s5496_s27, 1024  ;;  %p5291_p7 = scmp.lt.s32.totalorder %s5496_s27, %s5496_s27 }
  0x3a   : > { %p5284_p12 = scmp.ne.s32.totalorder %s5496_s27, %s5283_s24  ;;  %p5292_p8 = scmp.lt.s32.totalorder %s5283_s24, %s5283_s24 }
  0x3c   : > { %p5286_p3 = pnand %p5284_p12, %p5244_p2  ;;  %p5293_p9 = por %p5292_p8, %p5291_p7 }
  0x3e   : > { %p5287_p4 = pneg %p5286_p3 }
  0x40   : > { %p5294_p13 = pnand %p5293_p9, %p5287_p4 }
  0x42   : > { %5297 = shalt.err (!%p5294_p13)
}
  0x43   : > { %s5374_s30 = smov 64   ;;  %s5375_s15 = smov 4  }
  0x44   : > { %4997 = dma.hbm_to_vmem [thread:$0]  (!%p5492_p0), %s6520_s7, 1024, %s5496_s27, [#allocation10], %s5374_s30, %s5374_s30, %s5375_s15  }
  0x45   : > { %p4271_p1 = scmp.ge.s32.totalorder %s5368_s12, 2 }
  0x46   : > { %p6541_p2 = scmp.ne.s32.totalorder (!%p4271_p1), %s6535_s19, 0 }
  0x47   : > { %302 = sbr.rel (%p4271_p1) target bundleno = 96 (0x60), region = 48 }
  0x4e   : > { %305 = sbr.rel (!%p6541_p2) target bundleno = 96 (0x60), region = 52  ;;  %s307_s29 = sand.u32 (%p6541_p2), 1, %s5364_s11  }
  0x4f   : > { %s4272_s18 = sshll.u32 (%p6541_p2), %s5368_s12, 3  ;;  %s4979_s14 = smul.u32 (%p6541_p2), 224, %s307_s29 }
  0x50   : > { %s5555_s25 = scalar_lea.vmem (%p6541_p2), %s6513_s0, %s4272_s18 }
  0x51   : > { %v393_v0 = vld [vmem:[%s5555_s25] sm:$0xff] (%p6541_p2)  ;;  %v395_v1 = vld [vmem:[%s5555_s25 + $0x10] sm:$0xff] (%p6541_p2)  ;;  %s5563_s19 = scalar_lea.vmem (%p6541_p2), [#allocation5], %s4979_s14 }
  0x52   : > { %v397_v2 = vld [vmem:[%s5555_s25 + $0x20] sm:$0xff] (%p6541_p2)  ;;  %v399_v3 = vld [vmem:[%s5555_s25 + $0x30] sm:$0xff] (%p6541_p2)  ;;  %394 = vst [vmem:[%s5563_s19] sm:$0xff] (%p6541_p2), %v393_v0  ;;  %396 = vst [vmem:[%s5563_s19 + $0x8] sm:$0xff] (%p6541_p2), %v395_v1 }
  0x53   : > { %v401_v4 = vld [vmem:[%s5555_s25 + $0x40] sm:$0xff] (%p6541_p2)  ;;  %v403_v5 = vld [vmem:[%s5555_s25 + $0x50] sm:$0xff] (%p6541_p2)  ;;  %398 = vst [vmem:[%s5563_s19 + $0x10] sm:$0xff] (%p6541_p2), %v397_v2  ;;  %400 = vst [vmem:[%s5563_s19 + $0x18] sm:$0xff] (%p6541_p2), %v399_v3 }
  0x54   : > { %402 = vst [vmem:[%s5563_s19 + $0x20] sm:$0xff] (%p6541_p2), %v401_v4  ;;  %404 = vst [vmem:[%s5563_s19 + $0x28] sm:$0xff] (%p6541_p2), %v403_v5  ;;  %v405_v6 = vld [vmem:[%s5555_s25 + $0x60] sm:$0xff] (%p6541_p2)  ;;  %v407_v7 = vld [vmem:[%s5555_s25 + $0x70] sm:$0xff] (%p6541_p2) }
  0x55   : > { %v409_v8 = vld [vmem:[%s5555_s25 + $0x80] sm:$0xff]  ;;  %406 = vst [vmem:[%s5563_s19 + $0x30] sm:$0xff] %v405_v6  ;;  %408 = vst [vmem:[%s5563_s19 + $0x38] sm:$0xff] %v407_v7  ;;  %v411_v9 = vld [vmem:[%s5555_s25 + $0x90] sm:$0xff] }
  0x56   : > { %410 = vst [vmem:[%s5563_s19 + $0x40] sm:$0xff] %v409_v8  ;;  %v413_v10 = vld [vmem:[%s5555_s25 + $0xa0] sm:$0xff]  ;;  %v415_v11 = vld [vmem:[%s5555_s25 + $0xb0] sm:$0xff]  ;;  %412 = vst [vmem:[%s5563_s19 + $0x48] sm:$0xff] %v411_v9 }
  0x57   : > { %414 = vst [vmem:[%s5563_s19 + $0x50] sm:$0xff] %v413_v10  ;;  %416 = vst [vmem:[%s5563_s19 + $0x58] sm:$0xff] %v415_v11  ;;  %v417_v12 = vld [vmem:[%s5555_s25 + $0xc0] sm:$0xff]  ;;  %v419_v13 = vld [vmem:[%s5555_s25 + $0xd0] sm:$0xff] }
  0x58   : > { %v421_v14 = vld [vmem:[%s5555_s25 + $0xe0] sm:$0xff]  ;;  %418 = vst [vmem:[%s5563_s19 + $0x60] sm:$0xff] %v417_v12  ;;  %420 = vst [vmem:[%s5563_s19 + $0x68] sm:$0xff] %v419_v13  ;;  %v423_v15 = vld [vmem:[%s5555_s25 + $0xf0] sm:$0xff] }
  0x59   : > { %422 = vst [vmem:[%s5563_s19 + $0x70] sm:$0xff] %v421_v14  ;;  %v425_v16 = vld [vmem:[%s5555_s25 + $0x100] sm:$0xff]  ;;  %v427_v17 = vld [vmem:[%s5555_s25 + $0x110] sm:$0xff]  ;;  %424 = vst [vmem:[%s5563_s19 + $0x78] sm:$0xff] %v423_v15 }
  0x5a   : > { %426 = vst [vmem:[%s5563_s19 + $0x80] sm:$0xff] %v425_v16  ;;  %428 = vst [vmem:[%s5563_s19 + $0x88] sm:$0xff] %v427_v17  ;;  %v429_v18 = vld [vmem:[%s5555_s25 + $0x120] sm:$0xff]  ;;  %v431_v19 = vld [vmem:[%s5555_s25 + $0x130] sm:$0xff] }
  0x5b   : > { %v433_v20 = vld [vmem:[%s5555_s25 + $0x140] sm:$0xff]  ;;  %430 = vst [vmem:[%s5563_s19 + $0x90] sm:$0xff] %v429_v18  ;;  %432 = vst [vmem:[%s5563_s19 + $0x98] sm:$0xff] %v431_v19  ;;  %v435_v21 = vld [vmem:[%s5555_s25 + $0x150] sm:$0xff] }
  0x5c   : > { %434 = vst [vmem:[%s5563_s19 + $0xa0] sm:$0xff] %v433_v20  ;;  %v437_v22 = vld [vmem:[%s5555_s25 + $0x160] sm:$0xff]  ;;  %v439_v23 = vld [vmem:[%s5555_s25 + $0x170] sm:$0xff]  ;;  %436 = vst [vmem:[%s5563_s19 + $0xa8] sm:$0xff] %v435_v21 }
  0x5d   : > { %438 = vst [vmem:[%s5563_s19 + $0xb0] sm:$0xff] %v437_v22  ;;  %440 = vst [vmem:[%s5563_s19 + $0xb8] sm:$0xff] %v439_v23  ;;  %v441_v24 = vld [vmem:[%s5555_s25 + $0x180] sm:$0xff]  ;;  %v443_v25 = vld [vmem:[%s5555_s25 + $0x190] sm:$0xff] }
  0x5e   : > { %v445_v26 = vld [vmem:[%s5555_s25 + $0x1a0] sm:$0xff]  ;;  %442 = vst [vmem:[%s5563_s19 + $0xc0] sm:$0xff] %v441_v24  ;;  %444 = vst [vmem:[%s5563_s19 + $0xc8] sm:$0xff] %v443_v25  ;;  %v447_v27 = vld [vmem:[%s5555_s25 + $0x1b0] sm:$0xff] }
  0x5f   : > { %446 = vst [vmem:[%s5563_s19 + $0xd0] sm:$0xff] %v445_v26  ;;  %448 = vst [vmem:[%s5563_s19 + $0xd8] sm:$0xff] %v447_v27 }
  0x60 PF: > { %p6542_p0 = scmp.ne.s32.totalorder %s6539_s22, 0 }
  0x61   : > { %s5618_s27 = sand.u32 (!%p6542_p0), 1, %s5360_s10   ;;  %p6543_p5 = scmp.eq.s32.totalorder (!%p6542_p0), %s5451_s13, 0 }
  0x62   : > { %457 = sbr.rel (%p6542_p0) target bundleno = 1825 (0x721), region = 90 }
  0x63   : > { %s4980_s23 = smul.u32 (!%p6542_p0), 224, %s5618_s27 }
  0x65   : > { %s5621_s26 = scalar_lea.vmem (!%p6542_p0), [#allocation5], %s4980_s23 }
  0x69   : > { %5343 = dma.done.wait (%p6543_p5), [#allocation7], 2560   ;;  %p6544_p6 = pmov %p6543_p5 }
  0x6a   : > { %p6545_p10 = pmov %p6543_p5 }
  0x6b   : > { %5345 = vsyncadd (%p6544_p6), [#allocation7], 4294964736 }
  0x6c   : > { %5347 = dma.done.wait (%p6545_p10), [#allocation10], 1024   ;;  %p6546_p11 = pmov %p6543_p5 }
  0x6d   : > { %v6530_v28 = vmov 0   ;;  %v5048_v29 = vld [vmem:[#allocation6 + $0x24] ss:$8 sps:$4 sm:$0xff]   ;;  %v5050_v30 = vld [vmem:[#allocation6 + $0x20] ss:$8 sps:$4 sm:$0xff]   ;;  %vm599_vm0 = vcmask 1045504  }
  0x6e   : > { %5349 = vsyncadd (%p6546_p11), [#allocation10], 4294966272  ;;  %941 = vmatprep.mubr.bf16.mxu0 %v6530_v28  ;;  %638 = vmatprep.mubr.bf16.mxu1 %v6530_v28  ;;  %v5051_v31 = vld [vmem:[#allocation6 + $0x34] ss:$8 sps:$4 sm:$0x3f]   ;;  %v5634_v33 = vld [vmem:[%s5621_s26 + $0x8] sm:$0xff] }
  0x6f   : > { %909 = vmatprep.subr.bf16.mxu0 %v5048_v29  ;;  %v5053_v32 = vld [vmem:[#allocation6 + $0x30] ss:$8 sps:$4 sm:$0x3f]   ;;  %v5056_v36 = vld [vmem:[#allocation6 + $0x44] ss:$8 sps:$4 sm:$0xff]   ;;  %vm562_vm1 = vcmask 228352  }
  0x70   : > { %910 = vmatpush1.bf16.msra.mxu0 %v5050_v30  ;;  %v4295_v34 = vld [vmem:[%s5621_s26 + $0x10] sm:$0xff]  ;;  %v904_v35 = vsel %vm599_vm0, %v5053_v32, 0  ;;  %v5054_v37 = vld [vmem:[#allocation6 + $0x40] ss:$8 sps:$4 sm:$0xff]   ;;  %v4296_v38 = vld [vmem:[%s5621_s26 + $0x18] sm:$0xff]  ;;  %vm5378_vm2 = vmmov 0  }
  0x71   : > { %4322 = vmatprep.subr.msk.bf16.mxu0 %vm599_vm0, %v5051_v31  ;;  %v4297_v39 = vld [vmem:[%s5621_s26 + $0x20] sm:$0xff]  ;;  %v4298_v40 = vld [vmem:[%s5621_s26 + $0x28] sm:$0xff]  ;;  %v832_v41 = vpack.c.bf16 %v4295_v34, %v5634_v33  ;;  %v4299_v42 = vld [vmem:[%s5621_s26 + $0x30] sm:$0xff]  ;;  %v5646_v45 = vpack.c.bf16 %v4296_v38, %v4295_v34  ;;  %s4276_s18 = sshll.u32 %s5618_s27, 3  ;;  %s4647_s14 = sshll.u32 %s5451_s13, 7 }
  0x72   : > { %v4300_v43 = vld [vmem:[%s5621_s26 + $0x38] sm:$0xff]  ;;  %v4301_v44 = vld [vmem:[%s5621_s26 + $0x40] sm:$0xff]  ;;  %v5648_v46 = vpack.c.bf16 %v4298_v40, %v4297_v39  ;;  %v4302_v47 = vld [vmem:[%s5621_s26 + $0x48] sm:$0xff]  ;;  %v5667_v59 = vpack.c.bf16 %v4297_v39, %v4296_v38  ;;  %v5676_v0 = vpack.c.bf16 %v4299_v42, %v4298_v40  ;;  %s502_s16 = scalar_lea.vmem [#allocation11], %s4276_s18  ;;  %s6469_s23 = scalar_lea.hbm %s6522_s9, %s4647_s14 }
  0x73   : > { %v4303_v48 = vld [vmem:[%s5621_s26 + $0x50] sm:$0xff]  ;;  %v4304_v49 = vld [vmem:[%s5621_s26 + $0x58] sm:$0xff]  ;;  %v5653_v50 = vpack.c.bf16 %v4300_v43, %v4299_v42  ;;  %v5655_v51 = vpack.c.bf16 %v4302_v47, %v4301_v44  ;;  %v4305_v54 = vld [vmem:[%s5621_s26 + $0x60] sm:$0xff]  ;;  %v5685_v4 = vpack.c.bf16 %v4301_v44, %v4300_v43  ;;  %s4180_s17 = sshll.u32 %s502_s16, 4  ;;  %s4167_s22 = scalar_lea.sflag [#allocation8], %s5618_s27  ;;  %s6471_s17 = int_to_ptr.vmem [resolvable:$true] %s4180_s17 }
  0x74   : > { %912 = vmatpush1.bf16.msra.mxu0 %v904_v35  ;;  %v5657_v52 = vpack.c.bf16 %v4304_v49, %v4303_v48  ;;  %v5057_v53 = vld [vmem:[#allocation6 + $0x54] ss:$8 sps:$4 sm:$0x3f]   ;;  %v4306_v55 = vld [vmem:[%s5621_s26 + $0x68] sm:$0xff]  ;;  %v4309_v1 = vld [vmem:[%s5621_s26 + $0x80] sm:$0xff]  ;;  %v5694_v8 = vpack.c.bf16 %v4303_v48, %v4302_v47  ;;  %v5703_v12 = vpack.c.bf16 %v4305_v54, %v4304_v49  ;;  %s5298_s24 = scalar_lea.vmem %s6471_s17, 128 }
  0x75   : > { %1308 = vmatprep.subr.bf16.mxu0 %v5056_v36  ;;  %v5059_v56 = vld [vmem:[#allocation6 + $0x50] ss:$8 sps:$4 sm:$0x3f]   ;;  %v5663_v57 = vpack.c.bf16 %v4306_v55, %v4305_v54  ;;  %v5062_v60 = vld [vmem:[#allocation6 + $0x64] ss:$8 sps:$4 sm:$0xff]   ;;  %p5299_p12 = scmp.ne.s32.totalorder %s6471_s17, %s5298_s24  ;;  %p6548_p3 = scmp.ne.s32.totalorder %s6536_s20, 0 }
  0x76   : > { %v1303_v58 = vsel %vm599_vm0, %v5059_v56, 0  ;;  %v4307_v61 = vld [vmem:[%s5621_s26 + $0x70] sm:$0xff]  ;;  %v4308_v62 = vld [vmem:[%s5621_s26 + $0x78] sm:$0xff]  ;;  %v4310_v2 = vld [vmem:[%s5621_s26 + $0x88] sm:$0xff]  ;;  %s5379_s13 = smov [#allocation11]  }
  0x77   : > { %4323 = vmatmul.mubr.msk.bf16.vlgmr.msra.gmra.mrb[0].mxu0 %vm562_vm1, %v832_v41  ;;  %v5674_v63 = vpack.c.bf16 %v4308_v62, %v4307_v61  ;;  %v5683_v3 = vpack.c.bf16 %v4310_v2, %v4309_v1  ;;  %v4311_v5 = vld [vmem:[%s5621_s26 + $0x90] sm:$0xff]  ;;  %v4312_v6 = vld [vmem:[%s5621_s26 + $0x98] sm:$0xff]  ;;  %v4313_v9 = vld [vmem:[%s5621_s26 + $0xa0] sm:$0xff]  ;;  %v5712_v16 = vpack.c.bf16 %v4307_v61, %v4306_v55  ;;  %v5717_v17 = vpack.c.bf16 %v4309_v1, %v4308_v62  ;;  %p5300_p4 = pnand %p5299_p12, %p6548_p3  ;;  %s5302_s30 = sshll.u32 %s5379_s13, 4  ;;  %s5303_s30 = int_to_ptr.vmem [resolvable:$false] %s5302_s30 }
  0x78   : > { %1309 = vmatpush1.bf16.msra.mxu0 %v5054_v37  ;;  %951 = vmatprep.mubr.bf16.mxu0 %v6530_v28  ;;  %v5692_v7 = vpack.c.bf16 %v4312_v6, %v4311_v5  ;;  %v4314_v10 = vld [vmem:[%s5621_s26 + $0xa8] sm:$0xff]  ;;  %v4315_v13 = vld [vmem:[%s5621_s26 + $0xb0] sm:$0xff]  ;;  %v4316_v14 = vld [vmem:[%s5621_s26 + $0xb8] sm:$0xff]  ;;  %v5722_v18 = vpack.c.bf16 %v4311_v5, %v4310_v2  ;;  %v5727_v19 = vpack.c.bf16 %v4313_v9, %v4312_v6  ;;  %s5304_s15 = scalar_lea.vmem %s5303_s30, 256  ;;  %p5305_p8 = scmp.lt.s32.totalorder %s6471_s17, %s5303_s30 }
  0x79   : > { %4363 = vmatprep.subr.msk.bf16.mxu0 %vm599_vm0, %v5057_v53  ;;  %v5701_v11 = vpack.c.bf16 %v4314_v10, %v4313_v9  ;;  %v5710_v15 = vpack.c.bf16 %v4316_v14, %v4315_v13  ;;  %v5732_v20 = vpack.c.bf16 %v4315_v13, %v4314_v10  ;;  %v4317_v21 = vld [vmem:[%s5621_s26 + $0xc0] sm:$0xff]  ;;  %v5063_v24 = vld [vmem:[#allocation6 + $0x74] ss:$8 sps:$4 sm:$0x3f]   ;;  %v5087_v53 = vld [vmem:[%s6516_s3 + $0x30] ss:$8 sps:$4 sm:$0xff]   ;;  %p5301_p7 = pneg %p5300_p4  ;;  %p5306_p9 = scmp.lt.s32.totalorder %s5304_s15, %s5298_s24 }
  0x7a   : > { %v5738_v22 = vpack.c.bf16 %v4317_v21, %v4316_v14  ;;  %v5060_v23 = vld [vmem:[#allocation6 + $0x60] ss:$8 sps:$4 sm:$0xff]   ;;  %v5065_v25 = vld [vmem:[#allocation6 + $0x70] ss:$8 sps:$4 sm:$0x3f]  }
  0x7b   : > { %v1702_v26 = vsel %vm599_vm0, %v5065_v25, 0  ;;  %v5068_v27 = vld [vmem:[#allocation6 + $0x84] ss:$8 sps:$4 sm:$0xff]   ;;  %v5074_v30 = vld [vmem:[#allocation6] ss:$8 sps:$4 sm:$0xff]   ;;  %v4399_v54 = vld [vmem:[%s5621_s26 + $0xd0] sm:$0xff]  ;;  %p5307_p13 = por %p5306_p9, %p5305_p8 }
  0x7c   : > { %1311 = vmatpush1.bf16.msra.mxu0 %v1303_v58  ;;  %v5072_v29 = vld [vmem:[#allocation6 + $0x4] ss:$8 sps:$4 sm:$0xff]   ;;  %v5075_v31 = vld [vmem:[#allocation6 + $0x14] ss:$8 sps:$4 sm:$0x3f]  }
  0x7d   : > { %1707 = vmatprep.subr.bf16.mxu0 %v5062_v60  ;;  %606 = vmatprep.subr.bf16.mxu1 %v5072_v29  ;;  %v5077_v32 = vld [vmem:[#allocation6 + $0x10] ss:$8 sps:$4 sm:$0x3f]   ;;  %v504_v34 = vld [vmem:[%s5621_s26] sm:$0xff]  ;;  %v5083_v44 = vld [vmem:[%s6516_s3 + $0x14] ss:$8 sps:$4 sm:$0xff]   ;;  %p5308_p2 = pnand %p5307_p13, %p5301_p7 }
  0x7e   : > { %607 = vmatpush1.bf16.msra.mxu1 %v5074_v30  ;;  %v601_v35 = vsel %vm599_vm0, %v5077_v32, 0  ;;  %v528_v36 = vpack.c.bf16 %v5634_v33, %v504_v34  ;;  %v5791_v33 = vld [vmem:[%s5621_s26 + $0xc8] sm:$0xff]  ;;  %v5069_v39 = vld [vmem:[#allocation6 + $0x94] ss:$8 sps:$4 sm:$0x3f]  }
  0x7f   : > { %4324 = vmatmul.mubr.msk.bf16.gmra.mrb[4].mxu0 %vm562_vm1, %v5667_v59  ;;  %4281 = vmatprep.subr.msk.bf16.mxu1 %vm599_vm0, %v5075_v31  ;;  %v5794_v37 = vpack.c.bf16 %v5791_v33, %v4317_v21  ;;  %v5066_v38 = vld [vmem:[#allocation6 + $0x80] ss:$8 sps:$4 sm:$0xff]   ;;  %v5071_v40 = vld [vmem:[#allocation6 + $0x90] ss:$8 sps:$4 sm:$0x3f]   ;;  %v1641_v55 = vpack.c.bf16 %v4399_v54, %v5791_v33 }
  0x80   : > { %961 = vmatprep.mubr.bf16.mxu0 %v6530_v28  ;;  %v2101_v41 = vsel %vm599_vm0, %v5071_v40, 0  ;;  %v5078_v42 = vld [vmem:[%s6516_s3] ss:$8 sps:$4 sm:$0xff]   ;;  %v5080_v43 = vld [vmem:[%s6516_s3 + $0x4] ss:$8 sps:$4 sm:$0xff]  }
  0x81   : > { %v5086_v47 = vld [vmem:[%s6516_s3 + $0x24] ss:$8 sps:$4 sm:$0xff]   ;;  %v5084_v48 = vld [vmem:[%s6516_s3 + $0x20] ss:$8 sps:$4 sm:$0xff]   ;;  %v5089_v49 = vld [vmem:[%s6516_s3 + $0x34] ss:$8 sps:$4 sm:$0xff]  }
  0x82   : > { %609 = vmatpush1.bf16.msra.mxu1 %v601_v35  ;;  %v5090_v58 = vld [vmem:[%s6516_s3 + $0x40] ss:$8 sps:$4 sm:$0xff]   ;;  %v5093_v1 = vld [vmem:[%s6516_s3 + $0x50] ss:$8 sps:$4 sm:$0xff]  }
  0x83   : > { %2638 = vmatprep.subr.bf16.mxu1 %v5080_v43  ;;  %v5096_v6 = vld [vmem:[%s6516_s3 + $0x60] ss:$8 sps:$4 sm:$0xff]   ;;  %v5099_v9 = vld [vmem:[%s6516_s3 + $0x70] ss:$8 sps:$4 sm:$0xff]  }
  0x85   : > { %4282 = vmatmul.mubr.msk.bf16.vlgmr.msra.gmra.mrb[0].mxu1 %vm562_vm1, %v528_v36 }
  0x86   : > { %648 = vmatprep.mubr.bf16.mxu1 %v6530_v28  ;;  %2639 = vmatpush1.bf16.msra.mxu1 %v5078_v42 }
  0x87   : > { %4325 = vmatmul.mubr.msk.bf16.gmra.mrb[8].mxu0 %vm562_vm1, %v5676_v0  ;;  %2640 = vmatprep.subr.bf16.mxu1 %v5083_v44 }
  0x88   : > { %971 = vmatprep.mubr.bf16.mxu0 %v6530_v28 }
  0x8d   : > { %4283 = vmatmul.mubr.msk.bf16.gmra.mrb[4].mxu1 %vm562_vm1, %v5646_v45 }
  0x8e   : > { %658 = vmatprep.mubr.bf16.mxu1 %v6530_v28 }
  0x8f   : > { %4326 = vmatmul.mubr.msk.bf16.gmra.mrb[12].mxu0 %vm562_vm1, %v5685_v4 }
  0x90   : > { %981 = vmatprep.mubr.bf16.mxu0 %v6530_v28 }
  0x95   : > { %4284 = vmatmul.mubr.msk.bf16.gmra.mrb[8].mxu1 %vm562_vm1, %v5648_v46 }
  0x96   : > { %668 = vmatprep.mubr.bf16.mxu1 %v6530_v28 }
  0x97   : > { %4327 = vmatmul.mubr.msk.bf16.gmra.mrb[16].mxu0 %vm562_vm1, %v5694_v8 }
  0x98   : > { %991 = vmatprep.mubr.bf16.mxu0 %v6530_v28 }
  0x9d   : > { %4285 = vmatmul.mubr.msk.bf16.gmra.mrb[12].mxu1 %vm562_vm1, %v5653_v50 }
  0x9e   : > { %678 = vmatprep.mubr.bf16.mxu1 %v6530_v28 }
  0x9f   : > { %4328 = vmatmul.mubr.msk.bf16.gmra.mrb[20].mxu0 %vm562_vm1, %v5703_v12 }
  0xa0   : > { %1001 = vmatprep.mubr.bf16.mxu0 %v6530_v28 }
  0xa5   : > { %4286 = vmatmul.mubr.msk.bf16.gmra.mrb[16].mxu1 %vm562_vm1, %v5655_v51 }
  0xa6   : > { %688 = vmatprep.mubr.bf16.mxu1 %v6530_v28 }
  0xa7   : > { %4329 = vmatmul.mubr.msk.bf16.gmra.mrb[24].mxu0 %vm562_vm1, %v5712_v16 }
  0xa8   : > { %1011 = vmatprep.mubr.bf16.mxu0 %v6530_v28 }
  0xad   : > { %4287 = vmatmul.mubr.msk.bf16.gmra.mrb[20].mxu1 %vm562_vm1, %v5657_v52 }
  0xae   : > { %698 = vmatprep.mubr.bf16.mxu1 %v6530_v28 }
  0xaf   : > { %4330 = vmatmul.mubr.msk.bf16.gmra.mrb[28].mxu0 %vm562_vm1, %v5717_v17 }
  0xb0   : > { %1021 = vmatprep.mubr.bf16.mxu0 %v6530_v28 }
  0xb5   : > { %4288 = vmatmul.mubr.msk.bf16.gmra.mrb[24].mxu1 %vm562_vm1, %v5663_v57 }
  0xb6   : > { %708 = vmatprep.mubr.bf16.mxu1 %v6530_v28 }
  0xb7   : > { %4331 = vmatmul.mubr.msk.bf16.gmra.mrb[32].mxu0 %vm562_vm1, %v5722_v18 }
  0xb8   : > { %1031 = vmatprep.mubr.bf16.mxu0 %v6530_v28 }
  0xbd   : > { %4289 = vmatmul.mubr.msk.bf16.gmra.mrb[28].mxu1 %vm562_vm1, %v5674_v63 }
  0xbe   : > { %718 = vmatprep.mubr.bf16.mxu1 %v6530_v28 }
  0xbf   : > { %4332 = vmatmul.mubr.msk.bf16.gmra.mrb[36].mxu0 %vm562_vm1, %v5727_v19 }
  0xc0   : > { %1041 = vmatprep.mubr.bf16.mxu0 %v6530_v28 }
  0xc5   : > { %4290 = vmatmul.mubr.msk.bf16.gmra.mrb[32].mxu1 %vm562_vm1, %v5683_v3 }
  0xc6   : > { %728 = vmatprep.mubr.bf16.mxu1 %v6530_v28 }
  0xc7   : > { %4333 = vmatmul.mubr.msk.bf16.gmra.mrb[40].mxu0 %vm562_vm1, %v5732_v20 }
  0xc8   : > { %1051 = vmatprep.mubr.bf16.mxu0 %v6530_v28 }
  0xcd   : > { %4291 = vmatmul.mubr.msk.bf16.gmra.mrb[36].mxu1 %vm562_vm1, %v5692_v7 }
  0xce   : > { %738 = vmatprep.mubr.bf16.mxu1 %v6530_v28 }
  0xcf   : > { %4334 = vmatmul.mubr.msk.bf16.gmra.mrb[44].mxu0 %vm562_vm1, %v5738_v22 }
  0xd0   : > { %1340 = vmatprep.mubr.bf16.mxu0 %v6530_v28 }
  0xd5   : > { %4292 = vmatmul.mubr.msk.bf16.gmra.mrb[40].mxu1 %vm562_vm1, %v5701_v11 }
  0xd6   : > { %748 = vmatprep.mubr.bf16.mxu1 %v6530_v28 }
  0xd7   : > { %4364 = vmatmul.mubr.msk.bf16.vlgmr.msra.gmra.mrb[0].mxu0 %vm562_vm1, %v5646_v45  ;;  %v5081_v45 = vld [vmem:[%s6516_s3 + $0x10] ss:$8 sps:$4 sm:$0xff]  }
  0xd8   : > { %1708 = vmatpush1.bf16.msra.mxu0 %v5060_v23  ;;  %1350 = vmatprep.mubr.bf16.mxu0 %v6530_v28 }
  0xd9   : > { %4404 = vmatprep.subr.msk.bf16.mxu0 %vm599_vm0, %v5063_v24  ;;  %2641 = vmatpush1.bf16.msra.mxu1 %v5081_v45  ;;  %v5104_v24 = vld [vmem:[%s6516_s3 + $0x84] ss:$8 sps:$4 sm:$0xff]  }
  0xda   : > { %2642 = vmatprep.subr.bf16.mxu1 %v5086_v47 }
  0xdc   : > { %1710 = vmatpush1.bf16.msra.mxu0 %v1702_v26 }
  0xdd   : > { %2106 = vmatprep.subr.bf16.mxu0 %v5068_v27  ;;  %4293 = vmatmul.mubr.msk.bf16.gmra.mrb[44].mxu1 %vm562_vm1, %v5710_v15 }
  0xde   : > { %2670 = vmatprep.mubr.bf16.mxu1 %v6530_v28  ;;  %2643 = vmatpush1.bf16.msra.mxu1 %v5084_v48 }
  0xdf   : > { %4365 = vmatmul.mubr.msk.bf16.gmra.mrb[4].mxu0 %vm562_vm1, %v5648_v46  ;;  %2644 = vmatprep.subr.bf16.mxu1 %v5089_v49 }
  0xe0   : > { %1360 = vmatprep.mubr.bf16.mxu0 %v6530_v28 }
  0xe2   : > { %2645 = vmatpush1.bf16.msra.mxu1 %v5087_v53 }
  0xe7   : > { %4366 = vmatmul.mubr.msk.bf16.gmra.mrb[8].mxu0 %vm562_vm1, %v5653_v50 }
  0xe8   : > { %1370 = vmatprep.mubr.bf16.mxu0 %v6530_v28 }
  0xef   : > { %4367 = vmatmul.mubr.msk.bf16.gmra.mrb[12].mxu0 %vm562_vm1, %v5655_v51 }
  0xf0   : > { %1380 = vmatprep.mubr.bf16.mxu0 %v6530_v28 }
  0xf7   : > { %4368 = vmatmul.mubr.msk.bf16.gmra.mrb[16].mxu0 %vm562_vm1, %v5657_v52 }
  0xf8   : > { %1390 = vmatprep.mubr.bf16.mxu0 %v6530_v28 }
  0xff   : > { %4369 = vmatmul.mubr.msk.bf16.gmra.mrb[20].mxu0 %vm562_vm1, %v5663_v57 }
 0x100   : > { %1400 = vmatprep.mubr.bf16.mxu0 %v6530_v28 }
 0x107   : > { %4370 = vmatmul.mubr.msk.bf16.gmra.mrb[24].mxu0 %vm562_vm1, %v5674_v63 }
 0x108   : > { %1410 = vmatprep.mubr.bf16.mxu0 %v6530_v28 }
 0x10f   : > { %4371 = vmatmul.mubr.msk.bf16.gmra.mrb[28].mxu0 %vm562_vm1, %v5683_v3 }
 0x110   : > { %1420 = vmatprep.mubr.bf16.mxu0 %v6530_v28 }
 0x117   : > { %4372 = vmatmul.mubr.msk.bf16.gmra.mrb[32].mxu0 %vm562_vm1, %v5692_v7 }
 0x118   : > { %1430 = vmatprep.mubr.bf16.mxu0 %v6530_v28 }
 0x11f   : > { %4373 = vmatmul.mubr.msk.bf16.gmra.mrb[36].mxu0 %vm562_vm1, %v5701_v11 }
 0x120   : > { %1440 = vmatprep.mubr.bf16.mxu0 %v6530_v28 }
 0x127   : > { %4374 = vmatmul.mubr.msk.bf16.gmra.mrb[40].mxu0 %vm562_vm1, %v5710_v15 }
 0x128   : > { %1450 = vmatprep.mubr.bf16.mxu0 %v6530_v28 }
 0x12f   : > { %4375 = vmatmul.mubr.msk.bf16.gmra.mrb[44].mxu0 %vm562_vm1, %v5794_v37 }
 0x130   : > { %1739 = vmatprep.mubr.bf16.mxu0 %v6530_v28 }
 0x137   : > { %4405 = vmatmul.mubr.msk.bf16.vlgmr.msra.gmra.mrb[0].mxu0 %vm562_vm1, %v5667_v59  ;;  %v5092_v59 = vld [vmem:[%s6516_s3 + $0x44] ss:$8 sps:$4 sm:$0xff]  }
 0x138   : > { %2107 = vmatpush1.bf16.msra.mxu0 %v5066_v38  ;;  %1749 = vmatprep.mubr.bf16.mxu0 %v6530_v28 }
 0x139   : > { %4445 = vmatprep.subr.msk.bf16.mxu0 %vm599_vm0, %v5069_v39  ;;  %2646 = vmatprep.subr.bf16.mxu1 %v5092_v59 }
 0x13a   : > { %2647 = vmatpush1.bf16.msra.mxu1 %v5090_v58 }
 0x13c   : > { %2109 = vmatpush1.bf16.msra.mxu0 %v2101_v41 }
 0x13f   : > { %4406 = vmatmul.mubr.msk.bf16.gmra.mrb[4].mxu0 %vm562_vm1, %v5676_v0  ;;  %v5095_v0 = vld [vmem:[%s6516_s3 + $0x54] ss:$8 sps:$4 sm:$0xff]  }
 0x140   : > { %1759 = vmatprep.mubr.bf16.mxu0 %v6530_v28  ;;  %2648 = vmatprep.subr.bf16.mxu1 %v5095_v0 }
 0x141   : > { %2649 = vmatpush1.bf16.msra.mxu1 %v5093_v1 }
 0x147   : > { %4407 = vmatmul.mubr.msk.bf16.gmra.mrb[8].mxu0 %vm562_vm1, %v5685_v4  ;;  %v5098_v4 = vld [vmem:[%s6516_s3 + $0x64] ss:$8 sps:$4 sm:$0xff]  }
 0x148   : > { %1769 = vmatprep.mubr.bf16.mxu0 %v6530_v28  ;;  %2650 = vmatprep.subr.bf16.mxu1 %v5098_v4 }
 0x149   : > { %2651 = vmatpush1.bf16.msra.mxu1 %v5096_v6 }
 0x14f   : > { %4408 = vmatmul.mubr.msk.bf16.gmra.mrb[12].mxu0 %vm562_vm1, %v5694_v8  ;;  %v5101_v8 = vld [vmem:[%s6516_s3 + $0x74] ss:$8 sps:$4 sm:$0xff]  }
 0x150   : > { %1779 = vmatprep.mubr.bf16.mxu0 %v6530_v28  ;;  %2652 = vmatprep.subr.bf16.mxu1 %v5101_v8 }
 0x151   : > { %2653 = vmatpush1.bf16.msra.mxu1 %v5099_v9 }
 0x152   : > { %2837 = vmatprep.subr.bf16.mxu1 %v5104_v24 }
 0x157   : > { %4409 = vmatmul.mubr.msk.bf16.gmra.mrb[16].mxu0 %vm562_vm1, %v5703_v12 }
 0x158   : > { %1789 = vmatprep.mubr.bf16.mxu0 %v6530_v28 }
 0x15f   : > { %4410 = vmatmul.mubr.msk.bf16.gmra.mrb[20].mxu0 %vm562_vm1, %v5712_v16 }
 0x160   : > { %1799 = vmatprep.mubr.bf16.mxu0 %v6530_v28 }
 0x167   : > { %4411 = vmatmul.mubr.msk.bf16.gmra.mrb[24].mxu0 %vm562_vm1, %v5717_v17 }
 0x168   : > { %1809 = vmatprep.mubr.bf16.mxu0 %v6530_v28 }
 0x16f   : > { %4412 = vmatmul.mubr.msk.bf16.gmra.mrb[28].mxu0 %vm562_vm1, %v5722_v18 }
 0x170   : > { %1819 = vmatprep.mubr.bf16.mxu0 %v6530_v28 }
 0x177   : > { %4413 = vmatmul.mubr.msk.bf16.gmra.mrb[32].mxu0 %vm562_vm1, %v5727_v19 }
 0x178   : > { %1829 = vmatprep.mubr.bf16.mxu0 %v6530_v28 }
 0x17f   : > { %4414 = vmatmul.mubr.msk.bf16.gmra.mrb[36].mxu0 %vm562_vm1, %v5732_v20 }
 0x180   : > { %1839 = vmatprep.mubr.bf16.mxu0 %v6530_v28 }
 0x187   : > { %4415 = vmatmul.mubr.msk.bf16.gmra.mrb[40].mxu0 %vm562_vm1, %v5738_v22 }
 0x188   : > { %1849 = vmatprep.mubr.bf16.mxu0 %v6530_v28 }
 0x18f   : > { %4416 = vmatmul.mubr.msk.bf16.gmra.mrb[44].mxu0 %vm562_vm1, %v1641_v55 }
 0x190   : > { %2138 = vmatprep.mubr.bf16.mxu0 %v6530_v28 }
 0x197   : > { %4446 = vmatmul.mubr.msk.bf16.vlgmr.msra.gmra.mrb[0].mxu0 %vm562_vm1, %v5648_v46  ;;  %v5921_v46 = vpop.f32.mrb[0].mxu1 }
 0x198   : > { %2148 = vmatprep.mubr.bf16.mxu0 %v6530_v28 }
 0x19f   : > { %4447 = vmatmul.mubr.msk.bf16.gmra.mrb[4].mxu0 %vm562_vm1, %v5653_v50  ;;  %v4440_v50 = vld [vmem:[%s5621_s26 + $0xd8] sm:$0xff] }
 0x1a0   : > { %2158 = vmatprep.mubr.bf16.mxu0 %v6530_v28 }
 0x1a7   : > { %4448 = vmatmul.mubr.msk.bf16.gmra.mrb[8].mxu0 %vm562_vm1, %v5655_v51  ;;  %v5925_v51 = vpop.f32.mrb[1].mxu1 }
 0x1a8   : > { %2168 = vmatprep.mubr.bf16.mxu0 %v6530_v28 }
 0x1af   : > { %4449 = vmatmul.mubr.msk.bf16.gmra.mrb[12].mxu0 %vm562_vm1, %v5657_v52  ;;  %v5927_v52 = vpop.f32.mrb[2].mxu1 }
 0x1b0   : > { %2178 = vmatprep.mubr.bf16.mxu0 %v6530_v28  ;;  %v5929_v56 = vpop.f32.mrb[3].mxu1 }
 0x1b1   : > { %v5938_v60 = vpop.f32.mrb[4].mxu1 }
 0x1b2   : > { %v5940_v61 = vpop.f32.mrb[5].mxu1 }
 0x1b3   : > { %v5942_v62 = vpop.f32.mrb[6].mxu1 }
 0x1b7   : > { %4450 = vmatmul.mubr.msk.bf16.gmra.mrb[16].mxu0 %vm562_vm1, %v5663_v57  ;;  %v2040_v57 = vpack.c.bf16 %v4440_v50, %v4399_v54 }
 0x1b8   : > { %2188 = vmatprep.mubr.bf16.mxu0 %v6530_v28 }
 0x1bf   : > { %4451 = vmatmul.mubr.msk.bf16.gmra.mrb[20].mxu0 %vm562_vm1, %v5674_v63  ;;  %v5944_v63 = vpop.f32.mrb[7].mxu1 }
 0x1c0   : > { %2198 = vmatprep.mubr.bf16.mxu0 %v6530_v28  ;;  %v5952_v2 = vpop.f32.mrb[8].mxu1 }
 0x1c7   : > { %4452 = vmatmul.mubr.msk.bf16.gmra.mrb[24].mxu0 %vm562_vm1, %v5683_v3  ;;  %v5954_v3 = vpop.f32.mrb[9].mxu1 }
 0x1c8   : > { %2208 = vmatprep.mubr.bf16.mxu0 %v6530_v28  ;;  %v5959_v5 = vpop.f32.mrb[10].mxu1 }
 0x1cf   : > { %4453 = vmatmul.mubr.msk.bf16.gmra.mrb[28].mxu0 %vm562_vm1, %v5692_v7  ;;  %v5964_v7 = vpop.f32.mrb[11].mxu1 }
 0x1d0   : > { %2218 = vmatprep.mubr.bf16.mxu0 %v6530_v28  ;;  %v5972_v10 = vpop.f32.mrb[12].mxu1 }
 0x1d7   : > { %4454 = vmatmul.mubr.msk.bf16.gmra.mrb[32].mxu0 %vm562_vm1, %v5701_v11  ;;  %v5974_v11 = vpop.f32.mrb[13].mxu1 }
 0x1d8   : > { %2228 = vmatprep.mubr.bf16.mxu0 %v6530_v28  ;;  %v5976_v12 = vpop.f32.mrb[14].mxu1 }
 0x1d9   : > { %v5978_v13 = vpop.f32.mrb[15].mxu1 }
 0x1da   : > { %v5980_v14 = vpop.f32.mrb[16].mxu1 }
 0x1df   : > { %4455 = vmatmul.mubr.msk.bf16.gmra.mrb[36].mxu0 %vm562_vm1, %v5710_v15  ;;  %v5982_v15 = vpop.f32.mrb[17].mxu1 }
 0x1e0   : > { %2238 = vmatprep.mubr.bf16.mxu0 %v6530_v28  ;;  %v5984_v16 = vpop.f32.mrb[18].mxu1 }
 0x1e1   : > { %v5986_v17 = vpop.f32.mrb[19].mxu1 }
 0x1e2   : > { %v5988_v18 = vpop.f32.mrb[20].mxu1 }
 0x1e3   : > { %v5990_v19 = vpop.f32.mrb[21].mxu1 }
 0x1e4   : > { %v5992_v20 = vpop.f32.mrb[22].mxu1 }
 0x1e5   : > { %v5994_v21 = vpop.f32.mrb[23].mxu1 }
 0x1e6   : > { %v5996_v22 = vpop.f32.mrb[24].mxu1 }
 0x1e7   : > { %4456 = vmatmul.mubr.msk.bf16.gmra.mrb[40].mxu0 %vm562_vm1, %v5794_v37  ;;  %v5998_v23 = vpop.f32.mrb[25].mxu1 }
 0x1e8   : > { %2248 = vmatprep.mubr.bf16.mxu0 %v6530_v28  ;;  %v6003_v25 = vpop.f32.mrb[26].mxu1 }
 0x1e9   : > { %v6005_v26 = vpop.f32.mrb[27].mxu1 }
 0x1ea   : > { %v6007_v27 = vpop.f32.mrb[28].mxu1 }
 0x1eb   : > { %v6009_v29 = vpop.f32.mrb[29].mxu1 }
 0x1ec   : > { %v6011_v30 = vpop.f32.mrb[30].mxu1 }
 0x1ed   : > { %v6013_v31 = vpop.f32.mrb[31].mxu1 }
 0x1ee   : > { %v6015_v32 = vpop.f32.mrb[32].mxu1 }
 0x1ef   : > { %4457 = vmatmul.mubr.msk.bf16.gmra.mrb[44].mxu0 %vm562_vm1, %v2040_v57  ;;  %v6017_v34 = vpop.f32.mrb[33].mxu1 }
 0x1f0   : > { %v6019_v35 = vpop.f32.mrb[34].mxu1 }
 0x1f1   : > { %v6021_v36 = vpop.f32.mrb[35].mxu1 }
 0x1f2   : > { %v6023_v33 = vpop.f32.mrb[36].mxu1 }
 0x1f3   : > { %v6025_v37 = vpop.f32.mrb[37].mxu1 }
 0x1f4   : > { %v6027_v38 = vpop.f32.mrb[38].mxu1 }
 0x1f5   : > { %v6029_v39 = vpop.f32.mrb[39].mxu1 }
 0x1f6   : > { %v6031_v40 = vpop.f32.mrb[40].mxu1 }
 0x1f7   : > { %v6033_v41 = vpop.f32.mrb[41].mxu1 }
 0x1f8   : > { %v6035_v42 = vpop.f32.mrb[42].mxu1 }
 0x1f9   : > { %v6037_v43 = vpop.f32.mrb[43].mxu1 }
 0x1fa   : > { %v6039_v44 = vpop.f32.mrb[44].mxu1 }
 0x1fb   : > { %v6041_v45 = vpop.f32.mrb[45].mxu1 }
 0x1fc   : > { %v6043_v47 = vpop.f32.mrb[46].mxu1 }
 0x1fd   : > { %v6045_v48 = vpop.f32.mrb[47].mxu1 }
 0x26a   : > { %v2140_v49 = vpop.f32.mrb[0].mxu0 }
 0x26b   : > { %v4723_v53 = vadd.f32 %v2140_v49, %v5921_v46  ;;  %v2142_v54 = vpop.f32.mrb[1].mxu0 }
 0x26c   : > { %v4724_v55 = vadd.f32 %v2142_v54, %v5925_v51  ;;  %v2144_v50 = vpop.f32.mrb[2].mxu0 }
 0x26d   : > { %v4725_v57 = vadd.f32 %v2144_v50, %v5927_v52  ;;  %v2146_v58 = vpop.f32.mrb[3].mxu0  ;;  %v6058_v52 = vld [vmem:[%s6515_s2] ss:$0 sm:$0xff] }
 0x26e   : > { %v4726_v59 = vadd.f32 %v2146_v58, %v5929_v56 }
 0x26f   : > { %v2451_v0 = vmax.f32 %v4723_v53, %v4725_v57 }
 0x270   : > { %v2452_v1 = vmax.f32 %v4724_v55, %v4726_v59 }
 0x272   : > { %v2475_v4 = vmax.f32 %v2451_v0, %v2452_v1  ;;  %v2150_v6 = vpop.f32.mrb[4].mxu0 }
 0x273   : > { %v4727_v8 = vadd.f32 %v2150_v6, %v5938_v60  ;;  %v2152_v9 = vpop.f32.mrb[5].mxu0 }
 0x274   : > { %v4728_v24 = vadd.f32 %v2152_v9, %v5940_v61  ;;  %v2154_v28 = vpop.f32.mrb[6].mxu0  ;;  %v2494_v54 = vadd.f32 %v6058_v52, %v2475_v4  ;;  %v5102_v4 = vld [vmem:[%s6516_s3 + $0x80] ss:$8 sps:$4 sm:$0xff]   ;;  %v5107_v9 = vld [vmem:[%s6516_s3 + $0x94] ss:$8 sps:$4 sm:$0xff]  }
 0x275   : > { %v4729_v46 = vadd.f32 %v2154_v28, %v5942_v62  ;;  %v2156_v49 = vpop.f32.mrb[7].mxu0 }
 0x276   : > { %v4730_v51 = vadd.f32 %v2156_v49, %v5944_v63  ;;  %v2506_v59 = vmax.f32 %v2494_v54, 0.0  ;;  %v6547_v49 = vmov 0   ;;  %v5110_v54 = vld [vmem:[%s6516_s3 + $0xa4] ss:$8 sps:$4 sm:$0xff]  }
 0x277   : > { %v2453_v56 = vmax.f32 %v4727_v8, %v4729_v46 }
 0x278   : > { %v2454_v53 = vmax.f32 %v4728_v24, %v4730_v51 }
 0x27a   : > { %v2476_v55 = vmax.f32 %v2453_v56, %v2454_v53  ;;  %v2160_v60 = vpop.f32.mrb[8].mxu0 }
 0x27b   : > { %v4731_v50 = vadd.f32 %v2160_v60, %v5952_v2  ;;  %v2162_v61 = vpop.f32.mrb[9].mxu0 }
 0x27c   : > { %v2495_v57 = vadd.f32 %v6058_v52, %v2476_v55  ;;  %v4732_v28 = vadd.f32 %v2162_v61, %v5954_v3  ;;  %v2164_v62 = vpop.f32.mrb[10].mxu0 }
 0x27d   : > { %v4733_v63 = vadd.f32 %v2164_v62, %v5959_v5  ;;  %v2166_v58 = vpop.f32.mrb[11].mxu0  ;;  %v5113_v62 = vld [vmem:[%s6516_s3 + $0xb4] ss:$8 sps:$4 sm:$0xff]  }
 0x27e   : > { %v2507_v0 = vmax.f32 %v2495_v57, 0.0  ;;  %v4734_v1 = vadd.f32 %v2166_v58, %v5964_v7  ;;  %v5105_v7 = vld [vmem:[%s6516_s3 + $0x90] ss:$8 sps:$4 sm:$0xff]  }
 0x27f   : > { %v2455_v6 = vmax.f32 %v4731_v50, %v4733_v63 }
 0x280   : > { %v2538_v8 = vpack.c.bf16 %v2507_v0, %v2506_v59  ;;  %v2456_v2 = vmax.f32 %v4732_v28, %v4734_v1  ;;  %v5111_v59 = vld [vmem:[%s6516_s3 + $0xb0] ss:$8 sps:$4 sm:$0xff]  }
 0x282   : > { %v2477_v3 = vmax.f32 %v2455_v6, %v2456_v2  ;;  %v2170_v24 = vpop.f32.mrb[12].mxu0  ;;  %2671 = vmatmul.mubr.bf16.vlgmr.msra.gmra.mrb[48].mxu1 %v2538_v8 }
 0x283   : > { %v4735_v5 = vadd.f32 %v2170_v24, %v5972_v10  ;;  %v2172_v46 = vpop.f32.mrb[13].mxu0  ;;  %2680 = vmatprep.mubr.bf16.mxu1 %v6547_v49  ;;  %2838 = vmatpush1.bf16.msra.mxu1 %v5102_v4  ;;  %v5116_v4 = vld [vmem:[%s6516_s3 + $0xc4] ss:$8 sps:$4 sm:$0xff]  }
 0x284   : > { %v4736_v51 = vadd.f32 %v2172_v46, %v5974_v11  ;;  %v2174_v56 = vpop.f32.mrb[14].mxu0  ;;  %v2496_v53 = vadd.f32 %v6058_v52, %v2477_v3  ;;  %2839 = vmatprep.subr.bf16.mxu1 %v5107_v9  ;;  %v5108_v11 = vld [vmem:[%s6516_s3 + $0xa0] ss:$8 sps:$4 sm:$0xff]   ;;  %v5119_v46 = vld [vmem:[%s6516_s3 + $0xd4] ss:$8 sps:$4 sm:$0xff]  }
 0x285   : > { %v4737_v10 = vadd.f32 %v2174_v56, %v5976_v12  ;;  %v2176_v55 = vpop.f32.mrb[15].mxu0  ;;  %v5117_v56 = vld [vmem:[%s6516_s3 + $0xd0] ss:$8 sps:$4 sm:$0xff]  }
 0x286   : > { %v4738_v60 = vadd.f32 %v2176_v55, %v5978_v13  ;;  %v2508_v50 = vmax.f32 %v2496_v53, 0.0  ;;  %v5122_v55 = vld [vmem:[%s6516_s3 + $0xe4] ss:$8 sps:$4 sm:$0xff]  }
 0x287   : > { %v2457_v61 = vmax.f32 %v4735_v5, %v4737_v10  ;;  %2840 = vmatpush1.bf16.msra.mxu1 %v5105_v7 }
 0x288   : > { %v2458_v57 = vmax.f32 %v4736_v51, %v4738_v60  ;;  %v6087_v28 = vpack.c.bf16 %v2508_v50, %v2507_v0  ;;  %2841 = vmatprep.subr.bf16.mxu1 %v5110_v54 }
 0x28a   : > { %v2478_v63 = vmax.f32 %v2457_v61, %v2458_v57  ;;  %v2180_v12 = vpop.f32.mrb[16].mxu0 }
 0x28b   : > { %v4739_v58 = vadd.f32 %v2180_v12, %v5980_v14  ;;  %v2182_v13 = vpop.f32.mrb[17].mxu0  ;;  %2842 = vmatpush1.bf16.msra.mxu1 %v5108_v11 }
 0x28c   : > { %v4740_v1 = vadd.f32 %v2182_v13, %v5982_v15  ;;  %v2184_v6 = vpop.f32.mrb[18].mxu0  ;;  %v2497_v0 = vadd.f32 %v6058_v52, %v2478_v63  ;;  %2843 = vmatprep.subr.bf16.mxu1 %v5113_v62  ;;  %v5114_v15 = vld [vmem:[%s6516_s3 + $0xc0] ss:$8 sps:$4 sm:$0xff]   ;;  %v5125_v62 = vld [vmem:[%s6516_s3 + $0xf4] ss:$8 sps:$4 sm:$0xff]  }
 0x28d   : > { %v4741_v8 = vadd.f32 %v2184_v6, %v5984_v16  ;;  %v2186_v2 = vpop.f32.mrb[19].mxu0  ;;  %v5123_v13 = vld [vmem:[%s6516_s3 + $0xf0] ss:$8 sps:$4 sm:$0xff]  }
 0x28e   : > { %v4742_v14 = vadd.f32 %v2186_v2, %v5986_v17  ;;  %v2509_v9 = vmax.f32 %v2497_v0, 0.0  ;;  %v5128_v0 = vld [vmem:[%s6516_s3 + $0x104] ss:$8 sps:$4 sm:$0xff]  }
 0x28f   : > { %v2459_v3 = vmax.f32 %v4739_v58, %v4741_v8  ;;  %2844 = vmatpush1.bf16.msra.mxu1 %v5111_v59 }
 0x290   : > { %v2460_v24 = vmax.f32 %v4740_v1, %v4742_v14  ;;  %v6106_v5 = vpack.c.bf16 %v2509_v9, %v2508_v50  ;;  %2845 = vmatprep.subr.bf16.mxu1 %v5116_v4 }
 0x292   : > { %v2479_v7 = vmax.f32 %v2459_v3, %v2460_v24  ;;  %v2190_v16 = vpop.f32.mrb[20].mxu0  ;;  %2681 = vmatmul.mubr.bf16.gmra.mrb[52].mxu1 %v6106_v5 }
 0x293   : > { %v4743_v17 = vadd.f32 %v2190_v16, %v5988_v18  ;;  %v2192_v51 = vpop.f32.mrb[21].mxu0  ;;  %2690 = vmatprep.mubr.bf16.mxu1 %v6547_v49  ;;  %2846 = vmatpush1.bf16.msra.mxu1 %v5114_v15 }
 0x294   : > { %v4744_v53 = vadd.f32 %v2192_v51, %v5990_v19  ;;  %v2194_v54 = vpop.f32.mrb[22].mxu0  ;;  %v2498_v10 = vadd.f32 %v6058_v52, %v2479_v7  ;;  %2847 = vmatprep.subr.bf16.mxu1 %v5119_v46  ;;  %v5120_v19 = vld [vmem:[%s6516_s3 + $0xe0] ss:$8 sps:$4 sm:$0xff]  }
 0x295   : > { %v4745_v18 = vadd.f32 %v2194_v54, %v5992_v20  ;;  %v2196_v60 = vpop.f32.mrb[23].mxu0 }
 0x296   : > { %v4746_v50 = vadd.f32 %v2196_v60, %v5994_v21  ;;  %v2510_v61 = vmax.f32 %v2498_v10, 0.0 }
 0x297   : > { %v2461_v11 = vmax.f32 %v4743_v17, %v4745_v18  ;;  %2848 = vmatpush1.bf16.msra.mxu1 %v5117_v56 }
 0x298   : > { %v2462_v57 = vmax.f32 %v4744_v53, %v4746_v50  ;;  %2849 = vmatprep.subr.bf16.mxu1 %v5122_v55  ;;  %v6130_v63 = vpack.c.bf16 %v2510_v61, %v2509_v9 }
 0x29a   : > { %v2480_v12 = vmax.f32 %v2461_v11, %v2462_v57  ;;  %v2200_v20 = vpop.f32.mrb[24].mxu0 }
 0x29b   : > { %v4747_v58 = vadd.f32 %v2200_v20, %v5996_v22  ;;  %v2202_v21 = vpop.f32.mrb[25].mxu0  ;;  %2850 = vmatpush1.bf16.msra.mxu1 %v5120_v19 }
 0x29c   : > { %v4748_v59 = vadd.f32 %v2202_v21, %v5998_v23  ;;  %v2204_v1 = vpop.f32.mrb[26].mxu0  ;;  %v2499_v6 = vadd.f32 %v6058_v52, %v2480_v12  ;;  %2851 = vmatprep.subr.bf16.mxu1 %v5125_v62 }
 0x29d   : > { %v4749_v4 = vadd.f32 %v2204_v1, %v6003_v25  ;;  %v2206_v8 = vpop.f32.mrb[27].mxu0 }
 0x29e   : > { %v4750_v22 = vadd.f32 %v2206_v8, %v6005_v26  ;;  %v2511_v2 = vmax.f32 %v2499_v6, 0.0  ;;  %v5131_v8 = vld [vmem:[%s6516_s3 + $0x114] ss:$8 sps:$4 sm:$0xff]  }
 0x29f   : > { %v2463_v14 = vmax.f32 %v4747_v58, %v4749_v4  ;;  %2852 = vmatpush1.bf16.msra.mxu1 %v5123_v13  ;;  %v5126_v4 = vld [vmem:[%s6516_s3 + $0x100] ss:$8 sps:$4 sm:$0xff]  }
 0x2a0   : > { %v2464_v9 = vmax.f32 %v4748_v59, %v4750_v22  ;;  %v6143_v3 = vpack.c.bf16 %v2511_v2, %v2510_v61  ;;  %3068 = vmatprep.subr.bf16.mxu1 %v5128_v0 }
 0x2a2   : > { %v2481_v23 = vmax.f32 %v2463_v14, %v2464_v9  ;;  %v2210_v15 = vpop.f32.mrb[28].mxu0  ;;  %2691 = vmatmul.mubr.bf16.gmra.mrb[56].mxu1 %v6143_v3  ;;  %v5129_v14 = vld [vmem:[%s6516_s3 + $0x110] ss:$8 sps:$4 sm:$0xff]  }
 0x2a3   : > { %v4751_v24 = vadd.f32 %v2210_v15, %v6007_v27  ;;  %v2212_v46 = vpop.f32.mrb[29].mxu0  ;;  %2700 = vmatprep.mubr.bf16.mxu1 %v6547_v49  ;;  %v5134_v15 = vld [vmem:[%s6516_s3 + $0x124] ss:$8 sps:$4 sm:$0xff]  }
 0x2a4   : > { %v4752_v25 = vadd.f32 %v2212_v46, %v6009_v29  ;;  %v2214_v7 = vpop.f32.mrb[30].mxu0  ;;  %v2500_v26 = vadd.f32 %v6058_v52, %v2481_v23 }
 0x2a5   : > { %v4753_v16 = vadd.f32 %v2214_v7, %v6011_v30  ;;  %v2216_v17 = vpop.f32.mrb[31].mxu0 }
 0x2a6   : > { %v4754_v51 = vadd.f32 %v2216_v17, %v6013_v31  ;;  %v2512_v56 = vmax.f32 %v2500_v26, 0.0 }
 0x2a7   : > { %v2465_v53 = vmax.f32 %v4751_v24, %v4753_v16  ;;  %v5137_v16 = vld [vmem:[%s6516_s3 + $0x134] ss:$8 sps:$4 sm:$0xff]  }
 0x2a8   : > { %v2466_v54 = vmax.f32 %v4752_v25, %v4754_v51  ;;  %v6152_v10 = vpack.c.bf16 %v2512_v56, %v2511_v2 }
 0x2aa   : > { %v2482_v55 = vmax.f32 %v2465_v53, %v2466_v54  ;;  %v2220_v27 = vpop.f32.mrb[32].mxu0  ;;  %v5135_v53 = vld [vmem:[%s6516_s3 + $0x130] ss:$8 sps:$4 sm:$0xff]  }
 0x2ab   : > { %v4755_v18 = vadd.f32 %v2220_v27, %v6015_v32  ;;  %v2222_v60 = vpop.f32.mrb[33].mxu0  ;;  %v5140_v27 = vld [vmem:[%s6516_s3 + $0x144] ss:$8 sps:$4 sm:$0xff]  }
 0x2ac   : > { %v4756_v29 = vadd.f32 %v2222_v60, %v6017_v34  ;;  %v2224_v50 = vpop.f32.mrb[34].mxu0  ;;  %v2501_v61 = vadd.f32 %v6058_v52, %v2482_v55 }
 0x2ad   : > { %v4757_v30 = vadd.f32 %v2224_v50, %v6019_v35  ;;  %v2226_v11 = vpop.f32.mrb[35].mxu0 }
 0x2ae   : > { %v4758_v31 = vadd.f32 %v2226_v11, %v6021_v36  ;;  %v2513_v19 = vmax.f32 %v2501_v61, 0.0  ;;  %v5143_v11 = vld [vmem:[%s6516_s3 + $0x154] ss:$8 sps:$4 sm:$0xff]  }
 0x2af   : > { %v2467_v57 = vmax.f32 %v4755_v18, %v4757_v30 }
 0x2b0   : > { %v2468_v62 = vmax.f32 %v4756_v29, %v4758_v31  ;;  %v6159_v12 = vpack.c.bf16 %v2513_v19, %v2512_v56 }
 0x2b2   : > { %v2483_v20 = vmax.f32 %v2467_v57, %v2468_v62  ;;  %v2230_v58 = vpop.f32.mrb[36].mxu0  ;;  %2701 = vmatmul.mubr.bf16.gmra.mrb[60].mxu1 %v6159_v12 }
 0x2b3   : > { %v4759_v32 = vadd.f32 %v2230_v58, %v6023_v33  ;;  %v2232_v34 = vpop.f32.mrb[37].mxu0  ;;  %2869 = vmatprep.mubr.bf16.mxu1 %v6547_v49  ;;  %v5149_v58 = vld [vmem:[%s6516_s3 + $0x174] ss:$8 sps:$4 sm:$0xff]  }
 0x2b4   : > { %v4760_v21 = vadd.f32 %v2232_v34, %v6025_v37  ;;  %v2234_v35 = vpop.f32.mrb[38].mxu0  ;;  %v2502_v13 = vadd.f32 %v6058_v52, %v2483_v20  ;;  %v5144_v20 = vld [vmem:[%s6516_s3 + $0x160] ss:$8 sps:$4 sm:$0xff]   ;;  %v5152_v34 = vld [vmem:[%s6516_s3 + $0x184] ss:$8 sps:$4 sm:$0xff]  }
 0x2b5   : > { %v4761_v36 = vadd.f32 %v2234_v35, %v6027_v38  ;;  %v2236_v59 = vpop.f32.mrb[39].mxu0  ;;  %v5155_v35 = vld [vmem:[%s6516_s3 + $0x194] ss:$8 sps:$4 sm:$0xff]  }
 0x2b6   : > { %v4762_v1 = vadd.f32 %v2236_v59, %v6029_v39  ;;  %v2514_v6 = vmax.f32 %v2502_v13, 0.0  ;;  %v5153_v13 = vld [vmem:[%s6516_s3 + $0x190] ss:$8 sps:$4 sm:$0xff]   ;;  %v5156_v59 = vld [vmem:[%s6516_s3 + $0x1a0] ss:$8 sps:$4 sm:$0xff]  }
 0x2b7   : > { %v2469_v0 = vmax.f32 %v4759_v32, %v4761_v36  ;;  %v5158_v36 = vld [vmem:[%s6516_s3 + $0x1a4] ss:$8 sps:$4 sm:$0xff]  }
 0x2b8   : > { %v2470_v33 = vmax.f32 %v4760_v21, %v4762_v1  ;;  %v6174_v37 = vpack.c.bf16 %v2514_v6, %v2513_v19  ;;  %v5150_v21 = vld [vmem:[%s6516_s3 + $0x180] ss:$8 sps:$4 sm:$0xff]   ;;  %v5159_v1 = vld [vmem:[%s6516_s3 + $0x1b0] ss:$8 sps:$4 sm:$0xff]  }
 0x2ba   : > { %v2484_v22 = vmax.f32 %v2469_v0, %v2470_v33  ;;  %v2240_v2 = vpop.f32.mrb[40].mxu0  ;;  %2870 = vmatmul.mubr.bf16.vlgmr.msra.gmra.mrb[48].mxu1 %v6087_v28  ;;  %v5162_v0 = vld [vmem:[%s6516_s3 + $0x1c0] ss:$8 sps:$4 sm:$0xff]   ;;  %v5165_v33 = vld [vmem:[%s6516_s3 + $0x1d0] ss:$8 sps:$4 sm:$0xff]  }
 0x2bb   : > { %v4763_v38 = vadd.f32 %v2240_v2, %v6031_v40  ;;  %v2242_v39 = vpop.f32.mrb[41].mxu0  ;;  %3069 = vmatpush1.bf16.msra.mxu1 %v5126_v4  ;;  %2879 = vmatprep.mubr.bf16.mxu1 %v6547_v49  ;;  %v5167_v4 = vld [vmem:[%s6516_s3 + $0x1d4] ss:$8 sps:$4 sm:$0xff]  }
 0x2bc   : > { %v4764_v9 = vadd.f32 %v2242_v39, %v6033_v41  ;;  %v2244_v23 = vpop.f32.mrb[42].mxu0  ;;  %3070 = vmatprep.subr.bf16.mxu1 %v5131_v8  ;;  %v2503_v28 = vadd.f32 %v6058_v52, %v2484_v22  ;;  %v5132_v41 = vld [vmem:[%s6516_s3 + $0x120] ss:$8 sps:$4 sm:$0xff]   ;;  %v5170_v8 = vld [vmem:[%s6516_s3 + $0x1e4] ss:$8 sps:$4 sm:$0xff]  }
 0x2bd   : > { %v4765_v40 = vadd.f32 %v2244_v23, %v6035_v42  ;;  %v2246_v24 = vpop.f32.mrb[43].mxu0  ;;  %v5168_v22 = vld [vmem:[%s6516_s3 + $0x1e0] ss:$8 sps:$4 sm:$0xff]   ;;  %v5173_v2 = vld [vmem:[%s6516_s3 + $0x1f4] ss:$8 sps:$4 sm:$0xff]  }
 0x2be   : > { %v4766_v46 = vadd.f32 %v2246_v24, %v6037_v43  ;;  %v2515_v25 = vmax.f32 %v2503_v28, 0.0  ;;  %v5176_v39 = vld [vmem:[%s6516_s3 + $0x204] ss:$8 sps:$4 sm:$0xff]   ;;  %v5177_v23 = vld [vmem:[%s6516_s3 + $0x210] ss:$8 sps:$4 sm:$0xff]  }
 0x2bf   : > { %v2471_v7 = vmax.f32 %v4763_v38, %v4765_v40  ;;  %3071 = vmatpush1.bf16.msra.mxu1 %v5129_v14  ;;  %v5171_v38 = vld [vmem:[%s6516_s3 + $0x1f0] ss:$8 sps:$4 sm:$0xff]   ;;  %v5174_v14 = vld [vmem:[%s6516_s3 + $0x200] ss:$8 sps:$4 sm:$0xff]   ;;  %v5188_v24 = vld [vmem:[%s6516_s3 + $0x244] ss:$8 sps:$4 sm:$0xff]  }
 0x2c0   : > { %v2472_v26 = vmax.f32 %v4764_v9, %v4766_v46  ;;  %3072 = vmatprep.subr.bf16.mxu1 %v5134_v15  ;;  %v6195_v17 = vpack.c.bf16 %v2515_v25, %v2514_v6  ;;  %v5164_v6 = vld [vmem:[%s6516_s3 + $0x1c4] ss:$8 sps:$4 sm:$0xff]   ;;  %v5179_v9 = vld [vmem:[%s6516_s3 + $0x214] ss:$8 sps:$4 sm:$0xff]   ;;  %v5180_v28 = vld [vmem:[%s6516_s3 + $0x220] ss:$8 sps:$4 sm:$0xff]  }
 0x2c1   : > { %v5182_v15 = vld [vmem:[%s6516_s3 + $0x224] ss:$8 sps:$4 sm:$0xff]   ;;  %v5183_v40 = vld [vmem:[%s6516_s3 + $0x230] ss:$8 sps:$4 sm:$0xff]   ;;  %v5186_v46 = vld [vmem:[%s6516_s3 + $0x240] ss:$8 sps:$4 sm:$0xff]  }
 0x2c2   : > { %v2485_v51 = vmax.f32 %v2471_v7, %v2472_v26  ;;  %v2250_v42 = vpop.f32.mrb[44].mxu0  ;;  %2880 = vmatmul.mubr.bf16.gmra.mrb[52].mxu1 %v6130_v63  ;;  %v5194_v7 = vld [vmem:[%s6516_s3 + $0x264] ss:$8 sps:$4 sm:$0xff]   ;;  %v5195_v26 = vld [vmem:[%s6516_s3 + $0x270] ss:$8 sps:$4 sm:$0xff]  }
 0x2c3   : > { %v4767_v43 = vadd.f32 %v2250_v42, %v6039_v44  ;;  %v2252_v56 = vpop.f32.mrb[45].mxu0  ;;  %3073 = vmatpush1.bf16.msra.mxu1 %v5132_v41  ;;  %2889 = vmatprep.mubr.bf16.mxu1 %v6547_v49  ;;  %v5192_v41 = vld [vmem:[%s6516_s3 + $0x260] ss:$8 sps:$4 sm:$0xff]  }
 0x2c4   : > { %v4768_v54 = vadd.f32 %v2252_v56, %v6041_v45  ;;  %v2254_v55 = vpop.f32.mrb[46].mxu0  ;;  %3074 = vmatprep.subr.bf16.mxu1 %v5137_v16  ;;  %v2504_v18 = vadd.f32 %v6058_v52, %v2485_v51  ;;  %v5138_v45 = vld [vmem:[%s6516_s3 + $0x140] ss:$8 sps:$4 sm:$0xff]   ;;  %v5202_v56 = vld [vmem:[%s6518_s5 + $0x50] sm:$0xff]  }
 0x2c5   : > { %v4769_v44 = vadd.f32 %v2254_v55, %v6043_v47  ;;  %v2256_v60 = vpop.f32.mrb[47].mxu0  ;;  %v5141_v47 = vld [vmem:[%s6516_s3 + $0x150] ss:$8 sps:$4 sm:$0xff]   ;;  %v5198_v16 = vld [vmem:[%s6518_s5 + $0x40] sm:$0xff]   ;;  %v5200_v42 = vld [vmem:[%s6518_s5 + $0x48] sm:$0xff]  }
 0x2c6   : > { %v4770_v29 = vadd.f32 %v2256_v60, %v6045_v48  ;;  %v2516_v50 = vmax.f32 %v2504_v18, 0.0  ;;  %v5146_v48 = vld [vmem:[%s6516_s3 + $0x164] ss:$8 sps:$4 sm:$0xff]   ;;  %v5211_v18 = vld [vmem:[%s6518_s5 + $0x30] sm:$0xff]   ;;  %v5213_v60 = vld [vmem:[%s6518_s5 + $0x38] sm:$0xff]  }
 0x2c7   : > { %v2473_v61 = vmax.f32 %v4767_v43, %v4769_v44  ;;  %3075 = vmatpush1.bf16.msra.mxu1 %v5135_v53  ;;  %v5199_v51 = vld [vmem:[%s6518_s5] sm:$0xff]   ;;  %v5201_v43 = vld [vmem:[%s6518_s5 + $0x8] sm:$0xff]   ;;  %v5203_v53 = vld [vmem:[%s6518_s5 + $0x10] sm:$0xff]  }
 0x2c8   : > { %v2474_v30 = vmax.f32 %v4768_v54, %v4770_v29  ;;  %3076 = vmatprep.subr.bf16.mxu1 %v5140_v27  ;;  %v6216_v31 = vpack.c.bf16 %v2516_v50, %v2515_v25  ;;  %v5189_v25 = vld [vmem:[%s6516_s3 + $0x250] ss:$8 sps:$4 sm:$0xff]   ;;  %v5209_v55 = vld [vmem:[%s6518_s5 + $0x28] sm:$0xff]   ;;  %v5214_v29 = vld [vmem:[%s6518_s5 + $0xc0] sm:$0xff]  }
 0x2c9   : > { %v5205_v54 = vld [vmem:[%s6518_s5 + $0x18] sm:$0xff]   ;;  %v5210_v27 = vld [vmem:[%s6518_s5 + $0x70] sm:$0xff]  }
 0x2ca   : > { %v2486_v19 = vmax.f32 %v2473_v61, %v2474_v30  ;;  %2890 = vmatmul.mubr.bf16.gmra.mrb[56].mxu1 %v6152_v10  ;;  %v5212_v44 = vld [vmem:[%s6518_s5 + $0x78] sm:$0xff]  }
 0x2cb   : > { %3077 = vmatpush1.bf16.msra.mxu1 %v5138_v45  ;;  %2899 = vmatprep.mubr.bf16.mxu1 %v6547_v49 }
 0x2cc   : > { %3078 = vmatprep.subr.bf16.mxu1 %v5143_v11  ;;  %v2505_v57 = vadd.f32 %v6058_v52, %v2486_v19  ;;  %v5147_v52 = vld [vmem:[%s6516_s3 + $0x170] ss:$8 sps:$4 sm:$0xff]  }
 0x2ce   : > { %v2517_v62 = vmax.f32 %v2505_v57, 0.0  ;;  %v4603_v57 = vld [vmem:[%s6517_s4] ss:$0 sm:$0xff] }
 0x2cf   : > { %3079 = vmatpush1.bf16.msra.mxu1 %v5141_v47 }
 0x2d0   : > { %3080 = vmatprep.subr.bf16.mxu1 %v5146_v48  ;;  %v6233_v32 = vpack.c.bf16 %v2517_v62, %v2516_v50 }
 0x2d2   : > { %2900 = vmatmul.mubr.bf16.gmra.mrb[60].mxu1 %v6174_v37 }
 0x2d3   : > { %3081 = vmatpush1.bf16.msra.mxu1 %v5144_v20  ;;  %3100 = vmatprep.mubr.bf16.mxu1 %v6547_v49 }
 0x2d4   : > { %3082 = vmatprep.subr.bf16.mxu1 %v5149_v58 }
 0x2d7   : > { %3083 = vmatpush1.bf16.msra.mxu1 %v5147_v52 }
 0x2d8   : > { %3299 = vmatprep.subr.bf16.mxu1 %v5152_v34 }
 0x2da   : > { %3101 = vmatmul.mubr.bf16.vlgmr.msra.gmra.mrb[48].mxu1 %v6106_v5  ;;  %v5161_v5 = vld [vmem:[%s6516_s3 + $0x1b4] ss:$8 sps:$4 sm:$0xff]  }
 0x2db   : > { %3300 = vmatpush1.bf16.msra.mxu1 %v5150_v21  ;;  %3110 = vmatprep.mubr.bf16.mxu1 %v6547_v49 }
 0x2dc   : > { %3301 = vmatprep.subr.bf16.mxu1 %v5155_v35 }
 0x2df   : > { %3302 = vmatpush1.bf16.msra.mxu1 %v5153_v13 }
 0x2e0   : > { %3303 = vmatprep.subr.bf16.mxu1 %v5158_v36 }
 0x2e2   : > { %3111 = vmatmul.mubr.bf16.gmra.mrb[52].mxu1 %v6143_v3 }
 0x2e3   : > { %3304 = vmatpush1.bf16.msra.mxu1 %v5156_v59  ;;  %3120 = vmatprep.mubr.bf16.mxu1 %v6547_v49 }
 0x2e4   : > { %3305 = vmatprep.subr.bf16.mxu1 %v5161_v5 }
 0x2e7   : > { %3306 = vmatpush1.bf16.msra.mxu1 %v5159_v1 }
 0x2e8   : > { %3307 = vmatprep.subr.bf16.mxu1 %v5164_v6 }
 0x2ea   : > { %3121 = vmatmul.mubr.bf16.gmra.mrb[56].mxu1 %v6159_v12 }
 0x2eb   : > { %3308 = vmatpush1.bf16.msra.mxu1 %v5162_v0  ;;  %3130 = vmatprep.mubr.bf16.mxu1 %v6547_v49 }
 0x2ec   : > { %3309 = vmatprep.subr.bf16.mxu1 %v5167_v4 }
 0x2ef   : > { %3310 = vmatpush1.bf16.msra.mxu1 %v5165_v33  ;;  %v5215_v33 = vld [vmem:[%s6518_s5 + $0x80] sm:$0xff]  }
 0x2f0   : > { %3311 = vmatprep.subr.bf16.mxu1 %v5170_v8 }
 0x2f2   : > { %3131 = vmatmul.mubr.bf16.gmra.mrb[60].mxu1 %v6195_v17 }
 0x2f3   : > { %3312 = vmatpush1.bf16.msra.mxu1 %v5168_v22  ;;  %3331 = vmatprep.mubr.bf16.mxu1 %v6547_v49  ;;  %v5216_v22 = vld [vmem:[%s6518_s5 + $0xc8] sm:$0xff]  }
 0x2f4   : > { %3313 = vmatprep.subr.bf16.mxu1 %v5173_v2 }
 0x2f7   : > { %3314 = vmatpush1.bf16.msra.mxu1 %v5171_v38 }
 0x2f8   : > { %3530 = vmatprep.subr.bf16.mxu1 %v5176_v39  ;;  %v5217_v39 = vld [vmem:[%s6518_s5 + $0x88] sm:$0xff]  }
 0x2fa   : > { %3332 = vmatmul.mubr.bf16.vlgmr.msra.gmra.mrb[48].mxu1 %v6130_v63  ;;  %v5185_v63 = vld [vmem:[%s6516_s3 + $0x234] ss:$8 sps:$4 sm:$0xff]  }
 0x2fb   : > { %3531 = vmatpush1.bf16.msra.mxu1 %v5174_v14  ;;  %3341 = vmatprep.mubr.bf16.mxu1 %v6547_v49 }
 0x2fc   : > { %3532 = vmatprep.subr.bf16.mxu1 %v5179_v9  ;;  %v5218_v9 = vld [vmem:[%s6518_s5 + $0xd0] sm:$0xff]  }
 0x2ff   : > { %3533 = vmatpush1.bf16.msra.mxu1 %v5177_v23 }
 0x300   : > { %3534 = vmatprep.subr.bf16.mxu1 %v5182_v15 }
 0x302   : > { %3342 = vmatmul.mubr.bf16.gmra.mrb[52].mxu1 %v6152_v10  ;;  %v5191_v10 = vld [vmem:[%s6516_s3 + $0x254] ss:$8 sps:$4 sm:$0xff]  }
 0x303   : > { %3535 = vmatpush1.bf16.msra.mxu1 %v5180_v28  ;;  %3351 = vmatprep.mubr.bf16.mxu1 %v6547_v49 }
 0x304   : > { %3536 = vmatprep.subr.bf16.mxu1 %v5185_v63 }
 0x307   : > { %3537 = vmatpush1.bf16.msra.mxu1 %v5183_v40  ;;  %v5219_v40 = vld [vmem:[%s6518_s5 + $0x90] sm:$0xff]  }
 0x308   : > { %3538 = vmatprep.subr.bf16.mxu1 %v5188_v24  ;;  %v5220_v24 = vld [vmem:[%s6518_s5 + $0xd8] sm:$0xff]  }
 0x30a   : > { %3352 = vmatmul.mubr.bf16.gmra.mrb[56].mxu1 %v6174_v37  ;;  %v5197_v37 = vld [vmem:[%s6516_s3 + $0x274] ss:$8 sps:$4 sm:$0xff]  }
 0x30b   : > { %3539 = vmatpush1.bf16.msra.mxu1 %v5186_v46  ;;  %3361 = vmatprep.mubr.bf16.mxu1 %v6547_v49 }
 0x30c   : > { %3540 = vmatprep.subr.bf16.mxu1 %v5191_v10 }
 0x30f   : > { %3541 = vmatpush1.bf16.msra.mxu1 %v5189_v25  ;;  %v5221_v25 = vld [vmem:[%s6518_s5 + $0x98] sm:$0xff]  }
 0x310   : > { %3542 = vmatprep.subr.bf16.mxu1 %v5194_v7  ;;  %v5222_v7 = vld [vmem:[%s6518_s5 + $0xe0] sm:$0xff]  }
 0x312   : > { %3362 = vmatmul.mubr.bf16.gmra.mrb[60].mxu1 %v6216_v31 }
 0x313   : > { %3543 = vmatpush1.bf16.msra.mxu1 %v5192_v41  ;;  %3562 = vmatprep.mubr.bf16.mxu1 %v6547_v49 }
 0x314   : > { %3544 = vmatprep.subr.bf16.mxu1 %v5197_v37 }
 0x317   : > { %3545 = vmatpush1.bf16.msra.mxu1 %v5195_v26  ;;  %v5223_v26 = vld [vmem:[%s6518_s5 + $0xa0] sm:$0xff]  }
 0x318   : > { %4650 = vmatprep.subr.bf16.mxu1 %v5198_v16  ;;  %v5224_v16 = vld [vmem:[%s6518_s5 + $0xe8] sm:$0xff]  }
 0x31a   : > { %3563 = vmatmul.mubr.bf16.vlgmr.msra.gmra.mrb[48].mxu1 %v6143_v3  ;;  %v5204_v3 = vld [vmem:[%s6518_s5 + $0x58] sm:$0xff]  }
 0x31b   : > { %3572 = vmatprep.mubr.bf16.mxu1 %v6547_v49  ;;  %4651 = vmatpush3.bf16.msra.mxu1 %v5199_v51  ;;  %v5225_v51 = vld [vmem:[%s6518_s5 + $0xa8] sm:$0xff]  }
 0x31c   : > { %4652 = vmatprep.subr.bf16.mxu1 %v5200_v42  ;;  %v5226_v42 = vld [vmem:[%s6518_s5 + $0xf0] sm:$0xff]  }
 0x31f   : > { %4653 = vmatpush3.bf16.msra.mxu1 %v5201_v43  ;;  %v5227_v43 = vld [vmem:[%s6518_s5 + $0xb0] sm:$0xff]  }
 0x320   : > { %4654 = vmatprep.subr.bf16.mxu1 %v5202_v56 }
 0x322   : > { %3573 = vmatmul.mubr.bf16.gmra.mrb[52].mxu1 %v6159_v12  ;;  %v5206_v12 = vld [vmem:[%s6518_s5 + $0x60] sm:$0xff]  }
 0x323   : > { %3582 = vmatprep.mubr.bf16.mxu1 %v6547_v49  ;;  %4655 = vmatpush3.bf16.msra.mxu1 %v5203_v53  ;;  %v5228_v53 = vld [vmem:[%s6518_s5 + $0xf8] sm:$0xff]  }
 0x324   : > { %4656 = vmatprep.subr.bf16.mxu1 %v5204_v3  ;;  %v5229_v3 = vld [vmem:[%s6518_s5 + $0xb8] sm:$0xff]  }
 0x327   : > { %4657 = vmatpush3.bf16.msra.mxu1 %v5205_v54 }
 0x328   : > { %4658 = vmatprep.subr.bf16.mxu1 %v5206_v12 }
 0x32a   : > { %3583 = vmatmul.mubr.bf16.gmra.mrb[56].mxu1 %v6195_v17  ;;  %v5208_v17 = vld [vmem:[%s6518_s5 + $0x68] sm:$0xff]  }
 0x32b   : > { %3592 = vmatprep.mubr.bf16.mxu1 %v6547_v49  ;;  %v5207_v49 = vld [vmem:[%s6518_s5 + $0x20] sm:$0xff]  }
 0x32c   : > { %4659 = vmatpush3.bf16.msra.mxu1 %v5207_v49  ;;  %v5230_v49 = vld [vmem:[#allocation9] sm:$0xff]  }
 0x32d   : > { %4660 = vmatprep.subr.bf16.mxu1 %v5208_v17  ;;  %v5377_v17 = vmov 0.0  }
 0x330   : > { %4661 = vmatpush3.bf16.msra.mxu1 %v5209_v55  ;;  %v5231_v55 = vld [vmem:[#allocation9 + $0x8] sm:$0xff]  }
 0x331   : > { %4662 = vmatprep.subr.bf16.mxu1 %v5210_v27  ;;  %v5232_v27 = vld [vmem:[#allocation9 + $0x10] sm:$0xff]  }
 0x332   : > { %3593 = vmatmul.mubr.bf16.gmra.mrb[60].mxu1 %v6233_v32 }
 0x334   : > { %4663 = vmatpush3.bf16.msra.mxu1 %v5211_v18  ;;  %v5233_v18 = vld [vmem:[#allocation9 + $0x18] sm:$0xff]  }
 0x335   : > { %4664 = vmatprep.subr.bf16.mxu1 %v5212_v44  ;;  %v5234_v44 = vld [vmem:[#allocation9 + $0x20] sm:$0xff]  }
 0x338   : > { %4665 = vmatpush3.bf16.msra.mxu1 %v5213_v60  ;;  %v5235_v60 = vld [vmem:[#allocation9 + $0x28] sm:$0xff]  }
 0x339   : > { %4672 = vmatprep.subr.bf16.mxu1 %v5214_v29  ;;  %v5236_v29 = vld [vmem:[#allocation9 + $0x30] sm:$0xff]  }
 0x3ed   : > { %v3564_v50 = vpop.f32.mrb[48].mxu1 }
 0x3ee   : > { %v3566_v61 = vpop.f32.mrb[49].mxu1 }
 0x3ef   : > { %v3568_v45 = vpop.f32.mrb[50].mxu1 }
 0x3f0   : > { %v3667_v30 = vmax.f32 %v3564_v50, %v3568_v45  ;;  %v3570_v11 = vpop.f32.mrb[51].mxu1  ;;  %v5237_v50 = vld [vmem:[#allocation9 + $0x38] sm:$0xff]  }
 0x3f1   : > { %v3668_v31 = vmax.f32 %v3566_v61, %v3570_v11 }
 0x3f3   : > { %v3675_v19 = vmax.f32 %v3667_v30, %v3668_v31 }
 0x3f5   : > { %v3574_v47 = vpop.f32.mrb[52].mxu1  ;;  %v3686_v52 = vadd.f32 %v4603_v57, %v3675_v19  ;;  %v4604_v19 = vld [vmem:[%s6519_s6] ss:$0 sm:$0xff] }
 0x3f6   : > { %v3576_v48 = vpop.f32.mrb[53].mxu1 }
 0x3f7   : > { %v3578_v62 = vpop.f32.mrb[54].mxu1  ;;  %v3690_v13 = vmax.f32 %v3686_v52, 0.0 }
 0x3f8   : > { %v3669_v20 = vmax.f32 %v3574_v47, %v3578_v62  ;;  %v3580_v58 = vpop.f32.mrb[55].mxu1 }
 0x3f9   : > { %v3670_v32 = vmax.f32 %v3576_v48, %v3580_v58  ;;  %v3694_v8 = vpack.c.bf16 %v3690_v13, %v3690_v13 }
 0x3fb   : > { %v3676_v34 = vmax.f32 %v3669_v20, %v3670_v32 }
 0x3fd   : > { %v3687_v21 = vadd.f32 %v4603_v57, %v3676_v34  ;;  %v3584_v35 = vpop.f32.mrb[56].mxu1 }
 0x3fe   : > { %v3586_v36 = vpop.f32.mrb[57].mxu1 }
 0x3ff   : > { %v3588_v59 = vpop.f32.mrb[58].mxu1  ;;  %v3691_v5 = vmax.f32 %v3687_v21, 0.0  ;;  %v4637_v21 = vld [vmem:[%s6521_s8] ss:$0 sm:$0xff] }
 0x400   : > { %v3671_v1 = vmax.f32 %v3584_v35, %v3588_v59  ;;  %v3590_v6 = vpop.f32.mrb[59].mxu1 }
 0x401   : > { %v3672_v0 = vmax.f32 %v3586_v36, %v3590_v6  ;;  %v3695_v4 = vpack.c.bf16 %v3691_v5, %v3691_v5 }
 0x403   : > { %v3677_v2 = vmax.f32 %v3671_v1, %v3672_v0  ;;  %3993 = vmatprep.mubr.bf16.mxu1 %v3695_v4 }
 0x404   : > { %3994 = vmatmul.mubr.bf16.vlgmr.msra.gmra.mrb[64].mxu1 %v3694_v8 }
 0x405   : > { %4673 = vmatpush3.bf16.msra.mxu1 %v5215_v33  ;;  %v3594_v38 = vpop.f32.mrb[60].mxu1  ;;  %v3688_v56 = vadd.f32 %v4603_v57, %v3677_v2 }
 0x406   : > { %v3596_v14 = vpop.f32.mrb[61].mxu1  ;;  %4674 = vmatprep.subr.bf16.mxu1 %v5216_v22 }
 0x407   : > { %v3598_v23 = vpop.f32.mrb[62].mxu1  ;;  %v3692_v54 = vmax.f32 %v3688_v56, 0.0 }
 0x408   : > { %v3673_v15 = vmax.f32 %v3594_v38, %v3598_v23  ;;  %v3600_v28 = vpop.f32.mrb[63].mxu1 }
 0x409   : > { %v3674_v63 = vmax.f32 %v3596_v14, %v3600_v28  ;;  %4675 = vmatpush3.bf16.msra.mxu1 %v5217_v39  ;;  %v3696_v12 = vpack.c.bf16 %v3692_v54, %v3692_v54 }
 0x40a   : > { %4676 = vmatprep.subr.bf16.mxu1 %v5218_v9 }
 0x40b   : > { %v3678_v46 = vmax.f32 %v3673_v15, %v3674_v63 }
 0x40d   : > { %v3689_v10 = vadd.f32 %v4603_v57, %v3678_v46  ;;  %4677 = vmatpush3.bf16.msra.mxu1 %v5219_v40 }
 0x40e   : > { %4678 = vmatprep.subr.bf16.mxu1 %v5220_v24 }
 0x40f   : > { %v3693_v41 = vmax.f32 %v3689_v10, 0.0 }
 0x411   : > { %4679 = vmatpush3.bf16.msra.mxu1 %v5221_v25  ;;  %v3697_v37 = vpack.c.bf16 %v3693_v41, %v3693_v41 }
 0x412   : > { %4680 = vmatprep.subr.bf16.mxu1 %v5222_v7 }
 0x413   : > { %4033 = vmatprep.mubr.bf16.mxu1 %v3697_v37 }
 0x415   : > { %4681 = vmatpush3.bf16.msra.mxu1 %v5223_v26 }
 0x416   : > { %4682 = vmatprep.subr.bf16.mxu1 %v5224_v16 }
 0x419   : > { %4683 = vmatpush3.bf16.msra.mxu1 %v5225_v51 }
 0x41a   : > { %4684 = vmatprep.subr.bf16.mxu1 %v5226_v42 }
 0x41d   : > { %4685 = vmatpush3.bf16.msra.mxu1 %v5227_v43 }
 0x41e   : > { %4686 = vmatprep.subr.bf16.mxu1 %v5228_v53 }
 0x421   : > { %4687 = vmatpush3.bf16.msra.mxu1 %v5229_v3 }
 0x422   : > { %4703 = vmatprep.subr.bf16.mxu1 %v5377_v17 }
 0x424   : > { %4034 = vmatmul.mubr.bf16.vlgmr.msra.gmra.mrb[68].mxu1 %v3696_v12 }
 0x425   : > { %4704 = vmatpush3.bf16.msra.mxu1 %v5230_v49  ;;  %4719 = vmatprep.mubr.msk.bf16.mxu1 %vm5378_vm2, %v5377_v17 }
 0x426   : > { %4705 = vmatprep.subr.bf16.mxu1 %v5377_v17 }
 0x429   : > { %4706 = vmatpush3.bf16.msra.mxu1 %v5231_v55 }
 0x42a   : > { %4707 = vmatprep.subr.bf16.mxu1 %v5377_v17 }
 0x42d   : > { %4708 = vmatpush3.bf16.msra.mxu1 %v5232_v27 }
 0x42e   : > { %4709 = vmatprep.subr.bf16.mxu1 %v5377_v17 }
 0x431   : > { %4710 = vmatpush3.bf16.msra.mxu1 %v5233_v18 }
 0x432   : > { %4711 = vmatprep.subr.bf16.mxu1 %v5377_v17 }
 0x435   : > { %4712 = vmatpush3.bf16.msra.mxu1 %v5234_v44 }
 0x436   : > { %4713 = vmatprep.subr.bf16.mxu1 %v5377_v17 }
 0x439   : > { %4714 = vmatpush3.bf16.msra.mxu1 %v5235_v60 }
 0x43a   : > { %4715 = vmatprep.subr.bf16.mxu1 %v5377_v17 }
 0x43d   : > { %4716 = vmatpush3.bf16.msra.mxu1 %v5236_v29 }
 0x43e   : > { %4717 = vmatprep.subr.bf16.mxu1 %v5377_v17 }
 0x441   : > { %4718 = vmatpush3.bf16.msra.mxu1 %v5237_v50 }
 0x4d7   : > { %v4666_v61 = vpop.f32.mrb[64].mxu1 }
 0x4d8   : > { %v4667_v45 = vpop.f32.mrb[65].mxu1 }
 0x4d9   : > { %v4668_v30 = vadd.f32 %v4667_v45, %v4666_v61  ;;  %v4669_v11 = vpop.f32.mrb[66].mxu1 }
 0x4da   : > { %v4670_v31 = vpop.f32.mrb[67].mxu1 }
 0x4db   : > { %v3996_v57 = vadd.f32 %v4668_v30, %v4604_v19 }
 0x4f7   : > { %v4688_v47 = vpop.f32.mrb[68].mxu1 }
 0x4f8   : > { %v4689_v48 = vpop.f32.mrb[69].mxu1 }
 0x4f9   : > { %v4690_v62 = vadd.f32 %v4689_v48, %v4688_v47  ;;  %v4691_v20 = vpop.f32.mrb[70].mxu1 }
 0x4fa   : > { %v4692_v58 = vpop.f32.mrb[71].mxu1 }
 0x4fb   : > { %v4036_v32 = vadd.f32 %v4690_v62, %v3996_v57 }
 0x4fd   : > { %v4041_v52 = vmax.f32 %v4036_v32, 0.0 }
 0x4ff   : > { %v4042_v34 = vpack.c.bf16 %v4041_v52, %v4041_v52 }
 0x501   : > { %4720 = vmatmul.mubr.bf16.vlgmr.msra.gmra.mrb[72].mxu1 %v4042_v34 }
 0x5d4   : > { %v4148_v35 = vpop.f32.mrb[72].mxu1 }
 0x5d5   : > { %v4149_v13 = vadd.f32 %v4637_v21, %v4148_v35  ;;  %v4721_v36 = vpop.f32.mrb[73].mxu1 }
 0x5d6   : > { %v4151_v59 = vpop.f32.mrb[74].mxu1 }
 0x5d7   : > { %4154 = vmax.xlane.f32.xlu0 %v4149_v13  ;;  %v4722_v5 = vpop.f32.mrb[75].mxu1 }
 0x664   : > { %v4155_v1 = vpop.xlane.xlu0 %4154 }
 0x665   : > { %v4156_v6 = vsub.f32 %v4149_v13, %v4155_v1 }
 0x667   : > { %v4157_v0 = vmul.f32 1.442695, %v4156_v6 }
 0x669   : > { %5238 = vpow2.f32 %v4157_v0 }
 0x673   : > { %v5239_v4 = vpop.eup %5238 }
 0x674   : > { %4159 = vadd.xlane.f32.xlu0 %v5239_v4 }
 0x701   : > { %v4160_v33 = vpop.xlane.xlu0 %4159 }
 0x702   : > { %5240 = vlog2.f32 %v4160_v33 }
 0x70c   : > { %v5241_v8 = vpop.eup %5240 }
 0x70d   : > { %v4162_v22 = vmul.f32 0.6931472, %v5241_v8 }
 0x70f   : > { %v4163_v2 = vadd.f32 %v4162_v22, %v4155_v1 }
 0x711   : > { %v4164_v38 = vsub.f32 %v4149_v13, %v4163_v2 }
 0x713   : > { %4165 = vst [vmem:[%s502_s16] sm:$0xff] %v4164_v38 }
 0x714   : > { %5311 = shalt.err (!%p5308_p2)
}
 0x715   : > { %s5312_s27 = scalar_lea.hbm %s6469_s23, 128  ;;  %s5316_s26 = scalar_lea.hbm %s6522_s9, 256 }
 0x716   : > { %p5313_p0 = scmp.ne.s32.totalorder %s6469_s23, %s5312_s27  ;;  %p5317_p10 = scmp.lt.u32.totalorder %s6469_s23, %s6522_s9 }
 0x717   : > { %p5318_p11 = scmp.lt.u32.totalorder %s5316_s26, %s5312_s27  ;;  %p5320_p4 = scmp.lt.u32.totalorder %s5312_s27, %s6469_s23 }
 0x718   : > { %p5314_p5 = pnand %p5313_p0, %p6548_p3 }
 0x719   : > { %p5319_p12 = por %p5318_p11, %p5317_p10 }
 0x71a   : > { %p5315_p6 = pneg %p5314_p5 }
 0x71b   : > { %p5321_p7 = por %p5320_p4, %p5319_p12 }
 0x71d   : > { %p5322_p8 = pnand %p5321_p7, %p5315_p6 }
 0x71f   : > { %5325 = shalt.err (!%p5322_p8)
}
 0x720   : > { %4989 = dma.vmem_to_hbm [thread:$0]  (%p6548_p3), %s6471_s17, 128, %s6469_s23, %s4167_s22  }
 0x721 PF: > { %s6549_s14 = sld [smem:[#allocation15_spill]]  ;;  %s6550_s16 = sld [smem:[#allocation18_spill]] }
 0x727   : > { %s4192_s25 = sand.u32 1, %s6549_s14   ;;  %p6551_p9 = scmp.ne.s32.totalorder %s6550_s16, 0 }
 0x728   : > { %s4193_s19 = scalar_lea.sflag [#allocation8], %s4192_s25 }
 0x729   : > { %p4999_p13 = pnand %p4271_p1, %p6551_p9 }
 0x72b   : > { %5351 = dma.done.wait (!%p4999_p13), %s4193_s19, 128  }
 0x72c   : > { %5353 = vsyncadd (!%p4999_p13), %s4193_s19, 4294967168  ;;  %s6552_s12 = sld [smem:[#allocation16_spill]]  ;;  %s6553_s24 = sld [smem:[#allocation17_spill]] }
 0x72d   : > { %s6554_s30 = smov %s5360_s10  ;;  %s6555_s10 = smov %s5364_s11 }
 0x732   : > { %p21_p2 = scmp.ge.s32.totalorder %s6552_s12, 4   ;;  %s6556_s11 = smov %s6553_s24 }
 0x734   :  { %23 = sbr.rel (!%p21_p2) target bundleno = 5 (0x5), region = 159 }
 0x73b   :  { %4198 = vsyncpa [#allocation7], 1 }
 0x73c   :  { %4200 = vsyncpa [#allocation7 + $0x1], 1 }
 0x73d   :  { %4201 = vsyncpa [#allocation10], 1 }
 0x73e   :  { %4202 = vsyncpa [#allocation8], 1 }
 0x73f   :  { %4204 = vsyncpa [#allocation8 + $0x1], 1 }

</bundles_post_ra>
